<compile_context>
chip_gen: v7x
topology: tpu7x:2x2x1
jax: 0.10.0
libtpu: 0.0.40
codegen_flags: <defaults>
</compile_context>

<pallas_src>
import functools

import numpy as np
import jax
import jax.numpy as jnp
from jax import lax
from jax.experimental import pallas as pl
from jax.experimental.pallas import tpu as pltpu

EPS = 1e-5
SLOPE = 0.01

# (parity, row/col offset) combos needed by the phase-space 3x3 conv.
RC = ((0, 0), (0, 1), (1, -1), (1, 0))


def _cparams():
    return pltpu.CompilerParams(dimension_semantics=("parallel",),
                                vmem_limit_bytes=64 * 1024 * 1024)


# ---------------------------------------------------------------------------
# Kernel 1: ConvTranspose2d(3x3, s=2, p=1, op=1) -- all 4 sub-pixel phases and
# the 1x1 stride-2 shortcut conv in ONE matmul, plus per-image BN partials.
# Output stays in phase layout: yph[n,i,j, (2a+b)*C + c] = y1[n, 2i+a, 2j+b, c]
# ---------------------------------------------------------------------------
def conv1_kernel(x_ref, w_ref, yph_ref, ysc_ref, st_ref):
    h = yph_ref.shape[1]
    w = yph_ref.shape[2]
    cin = x_ref.shape[3]
    cout = ysc_ref.shape[3]
    hw = h * w

    a00 = x_ref[0, 0:h, 0:w, :].reshape(hw, cin)
    a01 = x_ref[0, 0:h, 1:w + 1, :].reshape(hw, cin)
    a10 = x_ref[0, 1:h + 1, 0:w, :].reshape(hw, cin)
    a11 = x_ref[0, 1:h + 1, 1:w + 1, :].reshape(hw, cin)
    opnd = jnp.concatenate([a00, a01, a10, a11], axis=1).astype(jnp.bfloat16)

    y = jnp.dot(opnd, w_ref[...], preferred_element_type=jnp.float32)  # (hw, 5C)

    yph_ref[0] = y[:, :4 * cout].reshape(h, w, 4 * cout).astype(jnp.bfloat16)
    ysc_ref[0] = y[:, 4 * cout:].reshape(h, w, cout).astype(jnp.bfloat16)
    # per-image partial sums / sums-of-squares for BN1 (phases) and BN_s
    st_ref[0, 0:1, :] = jnp.sum(y, axis=0, keepdims=True)
    st_ref[0, 1:2, :] = jnp.sum(y * y, axis=0, keepdims=True)


def conv1_call(xp, wblk):
    n, hp1, wp1, cin = xp.shape
    h, w = hp1 - 1, wp1 - 1
    c5 = wblk.shape[1]
    cout = c5 // 5
    return pl.pallas_call(
        conv1_kernel,
        grid=(n,),
        in_specs=[pl.BlockSpec((1, hp1, wp1, cin), lambda i: (i, 0, 0, 0)),
                  pl.BlockSpec((4 * cin, c5), lambda i: (0, 0))],
        out_specs=(pl.BlockSpec((1, h, w, 4 * cout), lambda i: (i, 0, 0, 0)),
                   pl.BlockSpec((1, h, w, cout), lambda i: (i, 0, 0, 0)),
                   pl.BlockSpec((1, 2, c5), lambda i: (i, 0, 0))),
        out_shape=(jax.ShapeDtypeStruct((n, h, w, 4 * cout), jnp.bfloat16),
                   jax.ShapeDtypeStruct((n, h, w, cout), jnp.bfloat16),
                   jax.ShapeDtypeStruct((n, 2, c5), jnp.float32)),
        compiler_params=_cparams(),
    )(xp, wblk)


# ---------------------------------------------------------------------------
# Kernel 2: Conv2d(3x3, s=1, p=1) in phase space.  BN1-apply + LeakyReLU +
# bf16 cast happen once while filling a zero-halo scratch; the 16 shifted
# phase views are packed into one (H*W, 16C) operand and multiplied by a
# block-sparse (16C, 4C) weight -> one MXU matmul per image.  Emits per-image
# BN2 partials.
# ---------------------------------------------------------------------------
def conv2_kernel(yph_ref, sc1_ref, sh1_ref, wb_ref, y2_ref, st_ref,
                 zp_ref, ob_ref):
    h = yph_ref.shape[1]
    w = yph_ref.shape[2]
    c4 = yph_ref.shape[3]
    c = c4 // 4
    hw = h * w
    bf16 = jnp.bfloat16

    # Zero only the 1-element halo.  (Done every step, not under
    # pl.when(program_id==0): with a "parallel" grid the images may be split
    # across cores, each with its own scratch.  Four thin strips == cheap.)
    zp_ref[0:1, :, :] = jnp.zeros((1, w + 2, c4), bf16)
    zp_ref[h + 1:h + 2, :, :] = jnp.zeros((1, w + 2, c4), bf16)
    zp_ref[:, 0:1, :] = jnp.zeros((h + 2, 1, c4), bf16)
    zp_ref[:, w + 1:w + 2, :] = jnp.zeros((h + 2, 1, c4), bf16)

    # BN1-apply + LeakyReLU + bf16 cast, once, into the padded scratch.
    z = yph_ref[0].astype(jnp.float32) * sc1_ref[...] + sh1_ref[...]
    z = jnp.where(z > 0, z, SLOPE * z)
    zp_ref[1:h + 1, 1:w + 1, :] = z.astype(bf16)

    # Gather the 16 (row-combo x col-combo) shifted phase views into one
    # lane-dense (hw, 16*c) operand.
    for rci, (a, di) in enumerate(RC):
        for cci, (b, dj) in enumerate(RC):
            k = rci * 4 + cci
            blk = zp_ref[1 + di:1 + di + h, 1 + dj:1 + dj + w,
                         (2 * a + b) * c:(2 * a + b + 1) * c]
            ob_ref[:, k * c:(k + 1) * c] = blk.reshape(hw, c)

    acc = jnp.dot(ob_ref[...], wb_ref[...],
                  preferred_element_type=jnp.float32)        # (hw, 4c)
    y2_ref[0] = acc.reshape(h, w, c4).astype(bf16)
    st_ref[0, 0:1, :] = jnp.sum(acc, axis=0, keepdims=True)
    st_ref[0, 1:2, :] = jnp.sum(acc * acc, axis=0, keepdims=True)


def conv2_call(yph, sc1, sh1, wb):
    n, h, w, c4 = yph.shape
    c = c4 // 4
    vec = pl.BlockSpec((1, 1, c4), lambda i: (0, 0, 0))
    return pl.pallas_call(
        conv2_kernel,
        grid=(n,),
        in_specs=[pl.BlockSpec((1, h, w, c4), lambda i: (i, 0, 0, 0)),
                  vec, vec,
                  pl.BlockSpec((16 * c, c4), lambda i: (0, 0))],
        out_specs=(pl.BlockSpec((1, h, w, c4), lambda i: (i, 0, 0, 0)),
                   pl.BlockSpec((1, 2, c4), lambda i: (i, 0, 0))),
        out_shape=(jax.ShapeDtypeStruct((n, h, w, c4), jnp.bfloat16),
                   jax.ShapeDtypeStruct((n, 2, c4), jnp.float32)),
        scratch_shapes=[pltpu.VMEM((h + 2, w + 2, c4), jnp.bfloat16),
                        pltpu.VMEM((h * w, 16 * c), jnp.bfloat16)],
        compiler_params=_cparams(),
    )(yph, sc1, sh1, wb)


# ---------------------------------------------------------------------------
# Kernel 3: BN2-apply + shortcut-BN + residual add + final activation, fully
# vectorized.  The shortcut only touches phase (0,0), so no 75%-zeros map and
# no expansion matmul are ever needed.
# ---------------------------------------------------------------------------
def finalize_kernel(y2_ref, ysc_ref, scale_ref, shift_ref, scs_ref, out_ref,
                    *, relu):
    c = ysc_ref.shape[3]
    v = y2_ref[0].astype(jnp.float32) * scale_ref[...] + shift_ref[...]
    sc_add = ysc_ref[0].astype(jnp.float32) * scs_ref[...]
    v = jnp.concatenate([v[:, :, :c] + sc_add, v[:, :, c:]], axis=-1)
    if relu:
        v = jnp.where(v > 0, v, SLOPE * v)
    else:
        v = jnp.tanh(v)
    out_ref[0] = v


def finalize_call(y2, ysc, scale_all, shift_all, scs, relu):
    n, h, w, c4 = y2.shape
    c = c4 // 4
    return pl.pallas_call(
        functools.partial(finalize_kernel, relu=relu),
        grid=(n,),
        in_specs=[pl.BlockSpec((1, h, w, c4), lambda i: (i, 0, 0, 0)),
                  pl.BlockSpec((1, h, w, c), lambda i: (i, 0, 0, 0)),
                  pl.BlockSpec((1, 1, c4), lambda i: (0, 0, 0)),
                  pl.BlockSpec((1, 1, c4), lambda i: (0, 0, 0)),
                  pl.BlockSpec((1, 1, c), lambda i: (0, 0, 0))],
        out_specs=pl.BlockSpec((1, h, w, c4), lambda i: (i, 0, 0, 0)),
        out_shape=jax.ShapeDtypeStruct((n, h, w, c4), jnp.float32),
        compiler_params=_cparams(),
    )(y2, ysc, scale_all, shift_all, scs)


# ---------------------------------------------------------------------------
# Weight packing + tiny statistics math (plain JAX glue)
# ---------------------------------------------------------------------------
def build_conv1_block_weight(w1, ws, cin, cout):
    """(4*Cin, 5*Cout) block weight; col blocks: ee, eo, oe, oo, shortcut."""
    k = w1.astype(jnp.float32)              # ConvTranspose weight (Cin,Cout,3,3)
    wsq = ws[:, :, 0, 0].astype(jnp.float32)
    wb = jnp.zeros((4 * cin, 5 * cout), jnp.float32)

    def put(m, rb, cb, blk):
        return m.at[rb * cin:(rb + 1) * cin, cb * cout:(cb + 1) * cout].set(blk)

    wb = put(wb, 0, 0, k[:, :, 1, 1])        # a00 -> (even, even)
    wb = put(wb, 0, 1, k[:, :, 1, 2])        # a00 -> (even, odd)
    wb = put(wb, 0, 2, k[:, :, 2, 1])        # a00 -> (odd,  even)
    wb = put(wb, 0, 3, k[:, :, 2, 2])        # a00 -> (odd,  odd)
    wb = put(wb, 0, 4, wsq)                  # a00 -> shortcut
    wb = put(wb, 1, 1, k[:, :, 1, 0])        # a01 -> (even, odd)
    wb = put(wb, 1, 3, k[:, :, 2, 0])        # a01 -> (odd,  odd)
    wb = put(wb, 2, 2, k[:, :, 0, 1])        # a10 -> (odd,  even)
    wb = put(wb, 2, 3, k[:, :, 0, 2])        # a10 -> (odd,  odd)
    wb = put(wb, 3, 3, k[:, :, 0, 0])        # a11 -> (odd,  odd)
    return wb.astype(jnp.bfloat16)


def build_conv2_block_weight(w2, c):
    """(16*C, 4*C) block-sparse weight for the phase-space 3x3 conv."""
    w2f = w2.astype(jnp.float32)             # Conv2d weight (Cout, Cin, 3, 3)
    wb = jnp.zeros((16 * c, 4 * c), jnp.float32)
    for alpha in range(2):
        for dy in range(3):
            t = alpha + dy - 1
            a, di = t % 2, (t - t % 2) // 2
            rci = RC.index((a, di))
            for beta in range(2):
                for dx in range(3):
                    u = beta + dx - 1
                    b, dj = u % 2, (u - u % 2) // 2
                    cci = RC.index((b, dj))
                    r0 = (rci * 4 + cci) * c
                    c0 = (2 * alpha + beta) * c
                    wb = wb.at[r0:r0 + c, c0:c0 + c].set(w2f[:, :, dy, dx].T)
    return wb.astype(jnp.bfloat16)


def bn_affine(s, sq, count, gamma, beta, eps=EPS):
    """Training-mode BN collapsed to y = x*scale + shift (biased variance)."""
    mean = s / count
    var = sq / count - mean * mean
    scale = gamma / jnp.sqrt(var + eps)
    shift = beta - mean * scale
    return scale, shift


def resblock_t_forward(x_nchw, params, relu=True):
    w1, w2, ws = params["w1"], params["w2"], params["ws"]
    n, cin, h, w = x_nchw.shape
    cout = w1.shape[1]
    cnt = float(n * 4 * h * w)               # N * 2H * 2W

    x = jnp.transpose(x_nchw, (0, 2, 3, 1)).astype(jnp.float32)   # NHWC
    xp = jnp.pad(x, ((0, 0), (0, 1), (0, 1), (0, 0)))             # (N,H+1,W+1,Cin)

    # --- conv1 (all phases) + shortcut conv + BN partials ------------------
    wblk = build_conv1_block_weight(w1, ws, cin, cout)
    yph, ysc, st1 = conv1_call(xp, wblk)

    s_all = jnp.sum(st1[:, 0, :], axis=0)
    q_all = jnp.sum(st1[:, 1, :], axis=0)
    s1 = s_all[:4 * cout].reshape(4, cout).sum(0)
    q1 = q_all[:4 * cout].reshape(4, cout).sum(0)
    sc1, sh1 = bn_affine(s1, q1, cnt, params["g1"], params["b1"])
    scs, shs = bn_affine(s_all[4 * cout:], q_all[4 * cout:], cnt,
                         params["gs"], params["bs"])

    # --- conv2 in phase space with fused BN1-apply + LeakyReLU -------------
    wb2 = build_conv2_block_weight(w2, cout)
    y2, st2 = conv2_call(yph,
                         jnp.tile(sc1, 4).reshape(1, 1, 4 * cout),
                         jnp.tile(sh1, 4).reshape(1, 1, 4 * cout),
                         wb2)
    s2 = jnp.sum(st2[:, 0, :], axis=0).reshape(4, cout).sum(0)
    q2 = jnp.sum(st2[:, 1, :], axis=0).reshape(4, cout).sum(0)
    sc2, sh2 = bn_affine(s2, q2, cnt, params["g2"], params["b2"])

    # --- BN2 + shortcut-BN + residual + activation --------------------------
    outp = finalize_call(y2, ysc,
                         jnp.tile(sc2, 4).reshape(1, 1, 4 * cout),
                         jnp.tile(sh2 + shs, 4).reshape(1, 1, 4 * cout),
                         scs.reshape(1, 1, cout),
                         relu)

    # phase layout -> NCHW (the phase interleave rides the one transpose we
    # need anyway to return NCHW; no extra HBM round trip mid-pipeline).
    out = (outp.reshape(n, h, w, 2, 2, cout)
           .transpose(0, 5, 1, 3, 2, 4)
           .reshape(n, cout, 2 * h, 2 * w))
    return out


# ---------------------------------------------------------------------------
# Pure-JAX reference (lax convs + training-mode BN) for validation
# ---------------------------------------------------------------------------
def resblock_t_reference(x_nchw, params, relu=True):
    w1t, w2, ws = params["w1"], params["w2"], params["ws"]
    dn = ("NHWC", "HWIO", "NHWC")
    hp = lax.Precision.HIGHEST
    x = jnp.transpose(x_nchw, (0, 2, 3, 1)).astype(jnp.float32)

    def bn(y, gamma, beta, eps=EPS):
        mean = y.mean(axis=(0, 1, 2), keepdims=True)
        var = ((y - mean) ** 2).mean(axis=(0, 1, 2), keepdims=True)
        return ((y - mean) / jnp.sqrt(var + eps)
                * gamma.reshape(1, 1, 1, -1) + beta.reshape(1, 1, 1, -1))

    w1_taps = jnp.flip(w1t, axis=(2, 3)).transpose(2, 3, 0, 1)
    y1 = lax.conv_general_dilated(x, w1_taps, (1, 1), ((1, 2), (1, 2)),
                                  lhs_dilation=(2, 2), dimension_numbers=dn,
                                  precision=hp)
    z1 = bn(y1, params["g1"], params["b1"])
    z1 = jnp.where(z1 > 0, z1, SLOPE * z1)

    w2_taps = jnp.transpose(w2, (2, 3, 1, 0))
    left = bn(lax.conv_general_dilated(z1, w2_taps, (1, 1), ((1, 1), (1, 1)),
                                       dimension_numbers=dn, precision=hp),
              params["g2"], params["b2"])

    ws_hwio = jnp.transpose(ws, (2, 3, 0, 1))
    sc = bn(lax.conv_general_dilated(x, ws_hwio, (1, 1), ((0, 1), (0, 1)),
                                     lhs_dilation=(2, 2),
                                     dimension_numbers=dn, precision=hp),
            params["gs"], params["bs"])

    out = left + sc
    out = jnp.where(out > 0, out, SLOPE * out) if relu else jnp.tanh(out)
    return jnp.transpose(out, (0, 3, 1, 2))


# ---------------------------------------------------------------------------
if __name__ == "__main__":
    key = jax.random.PRNGKey(0)
    n, cin, cout, h, w = 2, 4, 8, 16, 16
    k0, k1, k2, k3 = jax.random.split(key, 4)

    x = jax.random.normal(k0, (n, cin, h, w), jnp.float32)
    params = dict(
        # ConvTranspose2d(cin, cout, 3, stride=2, pad=1, out_pad=1, bias=False)
        w1=jax.random.normal(k1, (cin, cout, 3, 3), jnp.float32) * 0.2,
        # Conv2d(cout, cout, 3, stride=1, pad=1, bias=False)
        w2=jax.random.normal(k2, (cout, cout, 3, 3), jnp.float32) * 0.2,
        # shortcut ConvTranspose2d(cin, cout, 1, stride=2, out_pad=1, bias=False)
        ws=jax.random.normal(k3, (cin, cout, 1, 1), jnp.float32) * 0.2,
        # BatchNorm parameters (PyTorch default init: weight=1, bias=0)
        g1=jnp.ones((cout,), jnp.float32), b1=jnp.zeros((cout,), jnp.float32),
        g2=jnp.ones((cout,), jnp.float32), b2=jnp.zeros((cout,), jnp.float32),
        gs=jnp.ones((cout,), jnp.float32), bs=jnp.zeros((cout,), jnp.float32),
    )

    out = jax.block_until_ready(resblock_t_forward(x, params, relu=True))
    assert out.shape == (n, cout, 2 * h, 2 * w), out.shape
    ref = jax.block_until_ready(resblock_t_reference(x, params, relu=True))
    # bf16 MXU operands + bf16 intermediates -> relaxed tolerance vs f32 ref.
    np.testing.assert_allclose(np.asarray(out), np.asarray(ref),
                               rtol=5e-2, atol=5e-2)

    out_t = jax.block_until_ready(resblock_t_forward(x, params, relu=False))
    ref_t = jax.block_until_ready(resblock_t_reference(x, params, relu=False))
    np.testing.assert_allclose(np.asarray(out_t), np.asarray(ref_t),
                               rtol=5e-2, atol=5e-2)

    print("KERNEL_OK")
</pallas_src>

<mosaic_0001>
module attributes {stable_mosaic.version = 11 : i64} {
  func.func @conv1_kernel(%arg0: i32, %arg1: memref<1x17x17x4xf32, #tpu.memory_space<vmem>>, %arg2: memref<16x40xbf16, #tpu.memory_space<vmem>>, %arg3: memref<1x16x16x32xbf16, #tpu.memory_space<vmem>>, %arg4: memref<1x16x16x8xbf16, #tpu.memory_space<vmem>>, %arg5: memref<1x2x40xf32, #tpu.memory_space<vmem>>) attributes {dimension_semantics = [#tpu.dimension_semantics<parallel>], iteration_bounds = array<i64: 2>, scalar_prefetch = 0 : i64, scratch_operands = 0 : i64, tpu.core_type = #tpu.core_type<tc>, window_params = [{transform_indices = @transform_0, window_bounds = array<i64: 1, 17, 17, 4>}, {pipeline_mode = #tpu.pipeline_mode<synchronous>, transform_indices = @transform_1, window_bounds = array<i64: 16, 40>}, {transform_indices = @transform_2, window_bounds = array<i64: 1, 16, 16, 32>}, {transform_indices = @transform_3, window_bounds = array<i64: 1, 16, 16, 8>}, {transform_indices = @transform_4, window_bounds = array<i64: 1, 2, 40>}]} {
    %c0 = arith.constant 0 : index
    %c0_0 = arith.constant 0 : index
    %c0_1 = arith.constant 0 : index
    %c0_2 = arith.constant 0 : index
    %0 = vector.load %arg1[%c0, %c0_0, %c0_1, %c0_2] : memref<1x17x17x4xf32, #tpu.memory_space<vmem>>, vector<1x16x16x4xf32>
    %1 = vector.shape_cast %0 : vector<1x16x16x4xf32> to vector<16x16x4xf32>
    %2 = vector.shape_cast %1 : vector<16x16x4xf32> to vector<256x4xf32>
    %c0_3 = arith.constant 0 : index
    %c0_4 = arith.constant 0 : index
    %c1 = arith.constant 1 : index
    %c0_5 = arith.constant 0 : index
    %3 = vector.load %arg1[%c0_3, %c0_4, %c1, %c0_5] : memref<1x17x17x4xf32, #tpu.memory_space<vmem>>, vector<1x16x16x4xf32>
    %4 = vector.shape_cast %3 : vector<1x16x16x4xf32> to vector<16x16x4xf32>
    %5 = vector.shape_cast %4 : vector<16x16x4xf32> to vector<256x4xf32>
    %c0_6 = arith.constant 0 : index
    %c1_7 = arith.constant 1 : index
    %c0_8 = arith.constant 0 : index
    %c0_9 = arith.constant 0 : index
    %6 = vector.load %arg1[%c0_6, %c1_7, %c0_8, %c0_9] : memref<1x17x17x4xf32, #tpu.memory_space<vmem>>, vector<1x16x16x4xf32>
    %7 = vector.shape_cast %6 : vector<1x16x16x4xf32> to vector<16x16x4xf32>
    %8 = vector.shape_cast %7 : vector<16x16x4xf32> to vector<256x4xf32>
    %c0_10 = arith.constant 0 : index
    %c1_11 = arith.constant 1 : index
    %c1_12 = arith.constant 1 : index
    %c0_13 = arith.constant 0 : index
    %9 = vector.load %arg1[%c0_10, %c1_11, %c1_12, %c0_13] : memref<1x17x17x4xf32, #tpu.memory_space<vmem>>, vector<1x16x16x4xf32>
    %10 = vector.shape_cast %9 : vector<1x16x16x4xf32> to vector<16x16x4xf32>
    %11 = vector.shape_cast %10 : vector<16x16x4xf32> to vector<256x4xf32>
    %12 = tpu.concatenate %2, %5, %8, %11 in 1 : vector<256x4xf32>, vector<256x4xf32>, vector<256x4xf32>, vector<256x4xf32> -> vector<256x16xf32>
    %13 = arith.truncf %12 : vector<256x16xf32> to vector<256x16xbf16>
    %c0_14 = arith.constant 0 : index
    %c0_15 = arith.constant 0 : index
    %14 = vector.load %arg2[%c0_14, %c0_15] : memref<16x40xbf16, #tpu.memory_space<vmem>>, vector<16x40xbf16>
    %cst = arith.constant dense<0.000000e+00> : vector<256x40xf32>
    %15 = tpu.matmul %13, %14, %cst {dimension_numbers = #tpu.dot_dimension_numbers<[1], [0], [0], [1], [0, 0, 1, 1], [], []>} : vector<256x16xbf16>, vector<16x40xbf16>, vector<256x40xf32> -> vector<256x40xf32>
    %16 = vector.extract_strided_slice %15 {offsets = [0, 0], sizes = [256, 32], strides = [1, 1]} : vector<256x40xf32> to vector<256x32xf32>
    %17 = vector.shape_cast %16 : vector<256x32xf32> to vector<16x16x32xf32>
    %18 = arith.truncf %17 : vector<16x16x32xf32> to vector<16x16x32xbf16>
    %c0_16 = arith.constant 0 : index
    %c0_17 = arith.constant 0 : index
    %c0_18 = arith.constant 0 : index
    %c0_19 = arith.constant 0 : index
    %19 = vector.load %arg3[%c0_16, %c0_17, %c0_18, %c0_19] : memref<1x16x16x32xbf16, #tpu.memory_space<vmem>>, vector<1x16x16x32xbf16>
    %20 = vector.shape_cast %19 : vector<1x16x16x32xbf16> to vector<16x16x32xbf16>
    %21 = vector.shape_cast %18 : vector<16x16x32xbf16> to vector<1x16x16x32xbf16>
    tpu.vector_store %arg3[%c0_16, %c0_17, %c0_18, %c0_19], %21 {strides = array<i32>} : memref<1x16x16x32xbf16, #tpu.memory_space<vmem>>, vector<1x16x16x32xbf16>,
    %22 = vector.extract_strided_slice %15 {offsets = [0, 32], sizes = [256, 8], strides = [1, 1]} : vector<256x40xf32> to vector<256x8xf32>
    %23 = vector.shape_cast %22 : vector<256x8xf32> to vector<16x16x8xf32>
    %24 = arith.truncf %23 : vector<16x16x8xf32> to vector<16x16x8xbf16>
    %c0_20 = arith.constant 0 : index
    %c0_21 = arith.constant 0 : index
    %c0_22 = arith.constant 0 : index
    %c0_23 = arith.constant 0 : index
    %25 = vector.load %arg4[%c0_20, %c0_21, %c0_22, %c0_23] : memref<1x16x16x8xbf16, #tpu.memory_space<vmem>>, vector<1x16x16x8xbf16>
    %26 = vector.shape_cast %25 : vector<1x16x16x8xbf16> to vector<16x16x8xbf16>
    %27 = vector.shape_cast %24 : vector<16x16x8xbf16> to vector<1x16x16x8xbf16>
    tpu.vector_store %arg4[%c0_20, %c0_21, %c0_22, %c0_23], %27 {strides = array<i32>} : memref<1x16x16x8xbf16, #tpu.memory_space<vmem>>, vector<1x16x16x8xbf16>,
    %cst_24 = arith.constant dense<0.000000e+00> : vector<40xf32>
    %28 = vector.multi_reduction <add>, %15, %cst_24 [0] : vector<256x40xf32> to vector<40xf32>
    %29 = vector.shape_cast %28 : vector<40xf32> to vector<1x40xf32>
    %c0_25 = arith.constant 0 : index
    %c0_26 = arith.constant 0 : index
    %c0_27 = arith.constant 0 : index
    %30 = vector.load %arg5[%c0_25, %c0_26, %c0_27] : memref<1x2x40xf32, #tpu.memory_space<vmem>>, vector<1x1x40xf32>
    %31 = vector.shape_cast %30 : vector<1x1x40xf32> to vector<1x40xf32>
    %32 = vector.shape_cast %29 : vector<1x40xf32> to vector<1x1x40xf32>
    tpu.vector_store %arg5[%c0_25, %c0_26, %c0_27], %32 {strides = array<i32>} : memref<1x2x40xf32, #tpu.memory_space<vmem>>, vector<1x1x40xf32>,
    %33 = arith.mulf %15, %15 : vector<256x40xf32>
    %cst_28 = arith.constant dense<0.000000e+00> : vector<40xf32>
    %34 = vector.multi_reduction <add>, %33, %cst_28 [0] : vector<256x40xf32> to vector<40xf32>
    %35 = vector.shape_cast %34 : vector<40xf32> to vector<1x40xf32>
    %c0_29 = arith.constant 0 : index
    %c1_30 = arith.constant 1 : index
    %c0_31 = arith.constant 0 : index
    %36 = vector.load %arg5[%c0_29, %c1_30, %c0_31] : memref<1x2x40xf32, #tpu.memory_space<vmem>>, vector<1x1x40xf32>
    %37 = vector.shape_cast %36 : vector<1x1x40xf32> to vector<1x40xf32>
    %38 = vector.shape_cast %35 : vector<1x40xf32> to vector<1x1x40xf32>
    tpu.vector_store %arg5[%c0_29, %c1_30, %c0_31], %38 {strides = array<i32>} : memref<1x2x40xf32, #tpu.memory_space<vmem>>, vector<1x1x40xf32>,
    return
  }
  func.func @transform_0(%arg0: i32) -> (i32, i32, i32, i32) {
    %c0_i32 = arith.constant 0 : i32
    %c0_i32_0 = arith.constant 0 : i32
    %c0_i32_1 = arith.constant 0 : i32
    %c0_i32_2 = arith.constant 0 : i32
    return %arg0, %c0_i32, %c0_i32_0, %c0_i32_1 : i32, i32, i32, i32
  }
  func.func @transform_1(%arg0: i32) -> (i32, i32) {
    %c0_i32 = arith.constant 0 : i32
    %c0_i32_0 = arith.constant 0 : i32
    %c0_i32_1 = arith.constant 0 : i32
    return %c0_i32, %c0_i32_0 : i32, i32
  }
  func.func @transform_2(%arg0: i32) -> (i32, i32, i32, i32) {
    %c0_i32 = arith.constant 0 : i32
    %c0_i32_0 = arith.constant 0 : i32
    %c0_i32_1 = arith.constant 0 : i32
    %c0_i32_2 = arith.constant 0 : i32
    return %arg0, %c0_i32, %c0_i32_0, %c0_i32_1 : i32, i32, i32, i32
  }
  func.func @transform_3(%arg0: i32) -> (i32, i32, i32, i32) {
    %c0_i32 = arith.constant 0 : i32
    %c0_i32_0 = arith.constant 0 : i32
    %c0_i32_1 = arith.constant 0 : i32
    %c0_i32_2 = arith.constant 0 : i32
    return %arg0, %c0_i32, %c0_i32_0, %c0_i32_1 : i32, i32, i32, i32
  }
  func.func @transform_4(%arg0: i32) -> (i32, i32, i32) {
    %c0_i32 = arith.constant 0 : i32
    %c0_i32_0 = arith.constant 0 : i32
    %c0_i32_1 = arith.constant 0 : i32
    return %arg0, %c0_i32, %c0_i32_0 : i32, i32, i32
  }
}

</mosaic_0001>

<bundles_post_ra>
// kernel: tpu_custom_call.1
= control target key start
LH: loop header
LB: loop body
LE: loop exit
PB: predicated region body
PF: predicated region fallthrough
CT: control target
= control target key end

     0   :  { %10 = vsyncpa [#allocation3], 0  ;;  %s3510_s0 = inlined_call_operand.hbm [shape: f32[2,17,17,4], index: 0, kind: input, shape index: {}]   ;;  %s3511_s1 = inlined_call_operand.hbm [shape: bf16[16,40], index: 1, kind: input, shape index: {}]   ;;  %s3512_s2 = inlined_call_operand.hbm [shape: bf16[2,16,16,32], index: 2, kind: output, shape index: {0}]   ;;  %s3513_s3 = inlined_call_operand.hbm [shape: bf16[2,16,16,8], index: 3, kind: output, shape index: {1}]   ;;  %s3514_s4 = inlined_call_operand.hbm [shape: f32[2,2,40], index: 4, kind: output, shape index: {2}]  }
   0x1   :  { %12 = vsyncpa [#allocation3 + $0x1], 0 }
   0x2   :  { %13 = vsyncpa [#allocation6], 0 }
   0x3   :  { %14 = vsyncpa [#allocation4], 0 }
   0x4   :  { %16 = vsyncpa [#allocation4 + $0x1], 0 }
   0x5   :  { %17 = vsyncpa [#allocation9], 0 }
   0x6   :  { %19 = vsyncpa [#allocation9 + $0x1], 0  ;;  %s2526_s15 = smov 0   ;;  %s2528_s16 = smov 0  }
   0x7   :  { %s2530_s17 = smov 0   ;;  %s2532_s18 = smov 0  }
   0x8 LB: > { %s2547_s19 = sadd.s32 4294967295, %s2485_s18   ;;  %s1757_s20 = sadd.s32 4294967294, %s2485_s18   ;;  %s2485_s18 = sphi %s2532_s18, %s3534_s18   ;;  %s2481_s17 = sphi %s2530_s17, %s3533_s17   ;;  %s2477_s16 = sphi %s2528_s16, %s3532_s16   ;;  %s2473_s15 = sphi %s2526_s15, %s3531_s15  }
   0x9   : > { %p45_p0 = scmp.ne.s32.totalorder %s2477_s16, %s2473_s15  ;;  %p3515_p1 = scmp.eq.s32.totalorder %s2547_s19, 0 }
   0xa   : > { %p96_p3 = scmp.eq.s32.totalorder %s1757_s20, 1  ;;  %p1758_p5 = scmp.ge.s32.totalorder %s2485_s18, 1 }
   0xb   : > { %p2558_p4 = por %p3515_p1, %p45_p0  ;;  %p155_p7 = scmp.lt.s32.totalorder %s2485_s18, 3 }
   0xc   : > { %p2563_p6 = por %p96_p3, %p45_p0  ;;  %s2487_s24 = smov [#allocation5]  }
   0xd   : > { %s3518_s21 = scalar_select %p2558_p4, 1, 0 }
   0xe   : > { %s3519_s22 = scalar_select %p2563_p6, 1, 0 }
   0xf   : > { %p2568_p8 = pnand %p1758_p5, %p155_p7  ;;  %s167_s25 = sshll.u32 %s2487_s24, 4  ;;  %s2572_s25 = int_to_ptr.vmem [resolvable:$true] %s167_s25 }
  0x10   : > { %s2584_s27 = sadd.s32 1, %s2485_s18   ;;  %s32_s28 = sadd.s32 1, %s2481_s17 }
  0x11   : > { %s3520_s23 = scalar_select %p2568_p8, 1, 0 }
  0x12   : > { %p1992_p9 = pneg %p2568_p8  ;;  %s29_s29 = ssub.s32 %s2485_s18, %s2584_s27 }
  0x13   : > { %s2297_s6 = scalar_lea.hbm %s3511_s1, 128 }
  0x14   : > { %p2579_p11 = pnand %p1992_p9, %p3515_p1  ;;  %p2298_p12 = scmp.ne.s32.totalorder %s3511_s1, %s2297_s6 }
  0x15   : > { %p2304_p5 = scmp.lt.u32.totalorder %s2297_s6, %s3511_s1 }
  0x16   : > { %p2299_p13 = pneg %p2579_p11 }
  0x18   : > { %p2300_p0 = pnand %p2299_p13, %p2298_p12 }
  0x1a   : > { %p2301_p3 = pneg %p2300_p0 }
  0x1c   : > { %p2306_p7 = pnand %p2304_p5, %p2301_p3 }
  0x1e   : > { %2309 = shalt.err (!%p2306_p7)
}
  0x1f   : > { %s2310_s11 = scalar_lea.vmem %s2572_s25, 128  ;;  %p2318_p2 = scmp.lt.s32.totalorder %s2572_s25, %s2572_s25 }
  0x20   : > { %p2311_p9 = scmp.ne.s32.totalorder %s2572_s25, %s2310_s11  ;;  %p2319_p6 = scmp.lt.s32.totalorder %s2310_s11, %s2310_s11 }
  0x22   : > { %p2313_p10 = pnand %p2311_p9, %p2299_p13  ;;  %p2320_p4 = por %p2319_p6, %p2318_p2 }
  0x24   : > { %p2314_p1 = pneg %p2313_p10 }
  0x26   : > { %p2321_p8 = pnand %p2320_p4, %p2314_p1 }
  0x28   : > { %2324 = shalt.err (!%p2321_p8)
}
  0x29   : > { %s2488_s12 = smov 64   ;;  %s2489_s13 = smov 4  }
  0x2a   : > { %1995 = dma.hbm_to_vmem [thread:$0]  (!%p2579_p11), %s3511_s1, 128, %s2572_s25, [#allocation6], %s2488_s12, %s2488_s12, %s2489_s13  }
  0x2b   : > { %p30_p2 = scmp.eq.s32.totalorder %s29_s29, 0  ;;  %p39_p1 = scmp.ne.s32.totalorder %s2481_s17, %s2477_s16 }
  0x2c   : > { %p40_p4 = scmp.eq.s32.totalorder %s2485_s18, 0  ;;  %p2011_p6 = scmp.lt.s32.totalorder %s2485_s18, 2 }
  0x2d   : > { %s2615_s30 = scalar_select %p30_p2, %s2481_s17, %s32_s28  }
  0x2e   : > { %p41_p8 = por %p40_p4, %p39_p1  ;;  %p3522_p10 = scmp.eq.s32.totalorder %s2547_s19, 1 }
  0x2f   : > { %s181_s6 = sand.u32 1, %s2481_s17   ;;  %s1978_s7 = smul.u32 6528, %s2485_s18 }
  0x30   : > { %p2619_p12 = por %p3522_p10, %p39_p1  ;;  %s1977_s8 = smul.u32 408, %s181_s6 }
  0x31   : > { %s2628_s10 = scalar_lea.hbm %s3510_s0, %s1978_s7  ;;  %p2630_p11 = pnand %p2011_p6, %p41_p8 }
  0x32   : > { %s185_s28 = scalar_lea.vmem [#allocation2], %s1977_s8  ;;  %s2636_s11 = scalar_lea.sflag [#allocation3], %s181_s6 }
  0x33   : > { %s192_s29 = sshll.u32 %s185_s28, 4  ;;  %s2325_s12 = scalar_lea.hbm %s2628_s10, 6528  ;;  %s2634_s29 = int_to_ptr.vmem [resolvable:$true] %s192_s29 }
  0x34   : > { %p2326_p13 = scmp.ne.s32.totalorder %s2628_s10, %s2325_s12  ;;  %p2327_p0 = pneg %p2630_p11 }
  0x35   : > { %s2330_s24 = scalar_lea.hbm %s3510_s0, 13056  ;;  %p2331_p7 = scmp.lt.u32.totalorder %s2628_s10, %s3510_s0 }
  0x36   : > { %p2328_p3 = pnand %p2327_p0, %p2326_p13  ;;  %p2332_p9 = scmp.lt.u32.totalorder %s2330_s24, %s2325_s12 }
  0x37   : > { %p2334_p1 = scmp.lt.u32.totalorder %s2325_s12, %s2628_s10 }
  0x38   : > { %p2329_p5 = pneg %p2328_p3  ;;  %p2333_p2 = por %p2332_p9, %p2331_p7 }
  0x3a   : > { %p2335_p4 = por %p2334_p1, %p2333_p2 }
  0x3c   : > { %p2336_p6 = pnand %p2335_p4, %p2329_p5 }
  0x3e   : > { %2339 = shalt.err (!%p2336_p6)
}
  0x3f   : > { %s2340_s6 = scalar_lea.vmem %s2634_s29, 6528  ;;  %s2490_s8 = smov [#allocation2]  }
  0x40   : > { %p2341_p8 = scmp.ne.s32.totalorder %s2634_s29, %s2340_s6  ;;  %s2345_s9 = sshll.u32 %s2490_s8, 4  ;;  %s2346_s9 = int_to_ptr.vmem [resolvable:$false] %s2345_s9 }
  0x41   : > { %s2347_s28 = scalar_lea.vmem %s2346_s9, 13056  ;;  %p2348_p3 = scmp.lt.s32.totalorder %s2634_s29, %s2346_s9 }
  0x42   : > { %p2343_p10 = pnand %p2341_p8, %p2327_p0  ;;  %p2349_p7 = scmp.lt.s32.totalorder %s2347_s28, %s2340_s6 }
  0x44   : > { %p2344_p13 = pneg %p2343_p10  ;;  %p2350_p9 = por %p2349_p7, %p2348_p3 }
  0x46   : > { %p2351_p2 = pnand %p2350_p9, %p2344_p13 }
  0x48   : > { %2354 = shalt.err (!%p2351_p2)
}
  0x49   : > { %s2491_s12 = smov 128   ;;  %s2492_s13 = smov 8  }
  0x4a   : > { %1999 = dma.hbm_to_vmem [thread:$0]  (!%p2630_p11), %s2628_s10, 6528, %s2634_s29, %s2636_s11, %s2491_s12, %s2491_s12, %s2492_s13  }
  0x4b   : > { %p3525_p0 = scmp.ne.s32.totalorder %s3520_s23, 0 }
  0x4c   : > { %s2667_s14 = sand.u32 (!%p3525_p0), 1, %s2477_s16   ;;  %p3526_p5 = scmp.ne.s32.totalorder (!%p3525_p0), %s3518_s21, 0 }
  0x4d   : > { %204 = sbr.rel (%p3525_p0) target bundleno = 694 (0x2b6), region = 28  ;;  %s207_s7 = scalar_lea.sflag (!%p3525_p0), [#allocation3], %s2667_s14 }
  0x4e   : > { %s1979_s24 = smul.u32 (!%p3525_p0), 408, %s2667_s14 }
  0x50   : > { %s2671_s26 = scalar_lea.vmem (!%p3525_p0), [#allocation2], %s1979_s24 }
  0x54   : > { %2456 = dma.done.wait (%p3526_p5), %s207_s7, 6528  }
  0x55   : > { %2458 = vsyncadd (%p3526_p5), %s207_s7, 4294960768  ;;  %p3527_p11 = scmp.eq.s32.totalorder %s2547_s19, 0 }
  0x57   : > { %2460 = dma.done.wait (%p3527_p11), [#allocation6], 128   ;;  %p3528_p1 = pmov %p3527_p11 }
  0x58   : > { %v284_v0 = vld [vmem:[%s2671_s26 + $0x19] sm:$0xff]  ;;  %v285_v1 = vld [vmem:[%s2671_s26 + $0x21] sm:$0xff]  ;;  %v283_v4 = vld [vmem:[%s2671_s26 + $0x9] sm:$0xff]  ;;  %s2493_s21 = smov 4   ;;  %s2494_s23 = smov 8   ;;  %vm763_vm0 = vcmask 31744  }
  0x59   : > { %2462 = vsyncadd (%p3528_p1), [#allocation6], 4294967168  ;;  %v282_v2 = vld [vmem:[%s2671_s26 + $0x1] sm:$0xff]  ;;  %v2066_v3 = vpack.i.bf16 %v285_v1, %v284_v0  ;;  %v300_v5 = vld [vmem:[%s2671_s26 + $0xd9] sm:$0xff]  ;;  %s2495_s10 = smov 12   ;;  %vm796_vm1 = vcmask 64512  }
  0x5a   : > { %v301_v6 = vld [vmem:[%s2671_s26 + $0xe1] sm:$0xff]  ;;  %v2056_v7 = vpack.i.bf16 %v283_v4, %v282_v2  ;;  %v299_v9 = vld [vmem:[%s2671_s26 + $0xc9] sm:$0xff]  ;;  %v2694_v12 = vld [vmem:[%s2671_s26 + $0xd8] sm:$0xff]  ;;  %vm829_vm2 = vcmask 97280   ;;  %vm886_vm3 = vcmask 130048   ;;  %s1764_s25 = sshll.u32 %s2667_s14, 7 }
  0x5b   : > { %v298_v8 = vld [vmem:[%s2671_s26 + $0xc1] sm:$0xff]  ;;  %2067 = vrot.lane.b32.xlu1 %v2066_v3, %s2493_s21  ;;  %v2071_v10 = vpack.i.bf16 %v301_v6, %v300_v5  ;;  %v2700_v14 = vld [vmem:[%s2671_s26 + $0x18] sm:$0xff]  ;;  %v2713_v18 = vld [vmem:[%s2671_s26 + $0xf0] sm:$0xff]  ;;  %vm1224_vm4 = vcmask 257024   ;;  %s3038_s29 = scalar_lea.vmem [#allocation7], %s1764_s25  ;;  %s2496_s11 = smov 96  }
  0x5c   : > { %2057 = vrot.lane.b32.xlu0 %v2056_v7, %s2493_s21  ;;  %v2691_v11 = vpack.i.bf16 %v299_v9, %v298_v8  ;;  %v2697_v13 = vld [vmem:[%s2671_s26 + $0xe0] sm:$0xff]  ;;  %v2716_v19 = vld [vmem:[%s2671_s26 + $0xf8] sm:$0xff]  ;;  %v2719_v20 = vld [vmem:[%s2671_s26 + $0x30] sm:$0xff]  ;;  %vm1386_vm5 = vcmask 326656   ;;  %s1922_s6 = sshll.u32 %s2547_s19, 11  ;;  %s1584_s12 = sshll.u32 %s3038_s29, 4  ;;  %s3230_s12 = int_to_ptr.vmem [resolvable:$true] %s1584_s12 }
  0x5d   : > { %v2703_v15 = vld [vmem:[%s2671_s26 + $0x20] sm:$0xff]  ;;  %v2081_v16 = vpack.i.bf16 %v2697_v13, %v2694_v12  ;;  %v2722_v21 = vld [vmem:[%s2671_s26 + $0x38] sm:$0xff]  ;;  %v2091_v22 = vpack.i.bf16 %v2716_v19, %v2713_v18  ;;  %v304_v31 = vld [vmem:[%s2671_s26 + $0x109] sm:$0xff]  ;;  %s3226_s28 = scalar_lea.hbm %s3512_s2, %s1922_s6  ;;  %s1561_s13 = scalar_lea.sflag [#allocation4], %s2667_s14 }
  0x5e   : > { %v2076_v17 = vpack.i.bf16 %v2703_v15, %v2700_v14  ;;  %v2086_v23 = vpack.i.bf16 %v2722_v21, %v2719_v20  ;;  %v1817_v24 = vld [vmem:[%s2671_s26 + $0xf1] sm:$0xff]  ;;  %v1818_v25 = vld [vmem:[%s2671_s26 + $0xf9] sm:$0xff]  ;;  %v288_v33 = vld [vmem:[%s2671_s26 + $0x49] sm:$0xff]  ;;  %s2355_s24 = scalar_lea.vmem %s3230_s12, 2048  ;;  %s2497_s7 = smov [#allocation7]  }
  0x5f   : > { %2072 = vrot.lane.b32.xlu1 %v2071_v10, %s2493_s21  ;;  %v1801_v26 = vld [vmem:[%s2671_s26 + $0x31] sm:$0xff]  ;;  %v1802_v27 = vld [vmem:[%s2671_s26 + $0x39] sm:$0xff]  ;;  %v2111_v28 = vpack.i.bf16 %v1818_v25, %v1817_v24  ;;  %v2747_v37 = vld [vmem:[%s2671_s26 + $0x108] sm:$0xff]  ;;  %p2356_p4 = scmp.ne.s32.totalorder %s3230_s12, %s2355_s24 }
  0x60   : > { %2062 = vrot.lane.b32.xlu0 %v2691_v11, %s2493_s21  ;;  %v2106_v29 = vpack.i.bf16 %v1802_v27, %v1801_v26  ;;  %v2296_v30 = vld [vmem:[#allocation5] sm:$0xff]   ;;  %v2753_v39 = vld [vmem:[%s2671_s26 + $0x48] sm:$0xff]  ;;  %v2765_v43 = vld [vmem:[%s2671_s26 + $0x120] sm:$0xff] }
  0x61   : > { %v305_v32 = vld [vmem:[%s2671_s26 + $0x111] sm:$0xff]  ;;  %1941 = vmatprep.subr.bf16.mxu0 %v2296_v30  ;;  %1975 = vmatprep.subr.bf16.mxu1 %v2296_v30  ;;  %v2768_v44 = vld [vmem:[%s2671_s26 + $0x128] sm:$0xff]  ;;  %v2771_v45 = vld [vmem:[%s2671_s26 + $0x60] sm:$0xff]  ;;  %p2357_p6 = pnand %p2356_p4, %p2619_p12 }
  0x62   : > { %v289_v34 = vld [vmem:[%s2671_s26 + $0x51] sm:$0xff]  ;;  %1942 = vmatpush3.bf16.msra.mxu0 %v2296_v30  ;;  %1976 = vmatpush3.bf16.msra.mxu1 %v2296_v30  ;;  %v2131_v35 = vpack.i.bf16 %v305_v32, %v304_v31  ;;  %v2774_v46 = vld [vmem:[%s2671_s26 + $0x68] sm:$0xff]  ;;  %v2151_v47 = vpack.i.bf16 %v2768_v44, %v2765_v43  ;;  %v308_v55 = vld [vmem:[%s2671_s26 + $0x139] sm:$0xff] }
  0x63   : > { %2082 = vrot.lane.b32.xlu1 %v2081_v16, %s2494_s23  ;;  %v2126_v36 = vpack.i.bf16 %v289_v34, %v288_v33  ;;  %v2750_v38 = vld [vmem:[%s2671_s26 + $0x110] sm:$0xff]  ;;  %v2146_v48 = vpack.i.bf16 %v2774_v46, %v2771_v45  ;;  %v1821_v49 = vld [vmem:[%s2671_s26 + $0x121] sm:$0xff]  ;;  %v292_v57 = vld [vmem:[%s2671_s26 + $0x79] sm:$0xff]  ;;  %p2358_p8 = pneg %p2357_p6 }
  0x64   : > { %2077 = vrot.lane.b32.xlu0 %v2076_v17, %s2494_s23  ;;  %v2756_v40 = vld [vmem:[%s2671_s26 + $0x50] sm:$0xff]  ;;  %v2141_v41 = vpack.i.bf16 %v2750_v38, %v2747_v37  ;;  %v1805_v51 = vld [vmem:[%s2671_s26 + $0x61] sm:$0xff]  ;;  %v2799_v61 = vld [vmem:[%s2671_s26 + $0x138] sm:$0xff] }
  0x65   : > { %v2136_v42 = vpack.i.bf16 %v2756_v40, %v2753_v39  ;;  %v1822_v50 = vld [vmem:[%s2671_s26 + $0x129] sm:$0xff]  ;;  %v309_v56 = vld [vmem:[%s2671_s26 + $0x141] sm:$0xff]  ;;  %v2805_v63 = vld [vmem:[%s2671_s26 + $0x78] sm:$0xff] }
  0x66   : > { %v1806_v52 = vld [vmem:[%s2671_s26 + $0x69] sm:$0xff]  ;;  %v2171_v53 = vpack.i.bf16 %v1822_v50, %v1821_v49  ;;  %v293_v58 = vld [vmem:[%s2671_s26 + $0x81] sm:$0xff]  ;;  %v2191_v59 = vpack.i.bf16 %v309_v56, %v308_v55  ;;  %v2820_v4 = vld [vmem:[%s2671_s26 + $0x158] sm:$0xff] }
  0x67   : > { %2092 = vrot.lane.b32.xlu1 %v2091_v22, %s2494_s23  ;;  %v2166_v54 = vpack.i.bf16 %v1806_v52, %v1805_v51  ;;  %v2186_v60 = vpack.i.bf16 %v293_v58, %v292_v57  ;;  %v2802_v62 = vld [vmem:[%s2671_s26 + $0x140] sm:$0xff]  ;;  %v2823_v5 = vld [vmem:[%s2671_s26 + $0x90] sm:$0xff]  ;;  %v2826_v6 = vld [vmem:[%s2671_s26 + $0x98] sm:$0xff] }
  0x68   : > { %2087 = vrot.lane.b32.xlu0 %v2086_v23, %s2494_s23  ;;  %v2808_v0 = vld [vmem:[%s2671_s26 + $0x80] sm:$0xff]  ;;  %v2201_v1 = vpack.i.bf16 %v2802_v62, %v2799_v61  ;;  %v2206_v8 = vpack.i.bf16 %v2826_v6, %v2823_v5  ;;  %v1825_v9 = vld [vmem:[%s2671_s26 + $0x151] sm:$0xff]  ;;  %v312_v24 = vld [vmem:[%s2671_s26 + $0x169] sm:$0xff] }
  0x69   : > { %v2196_v2 = vpack.i.bf16 %v2808_v0, %v2805_v63  ;;  %v1809_v16 = vld [vmem:[%s2671_s26 + $0x91] sm:$0xff]  ;;  %v1810_v17 = vld [vmem:[%s2671_s26 + $0x99] sm:$0xff]  ;;  %v296_v26 = vld [vmem:[%s2671_s26 + $0xa9] sm:$0xff] }
  0x6a   : > { %v2226_v23 = vpack.i.bf16 %v1810_v17, %v1809_v16  ;;  %v313_v25 = vld [vmem:[%s2671_s26 + $0x171] sm:$0xff]  ;;  %v2851_v30 = vld [vmem:[%s2671_s26 + $0x168] sm:$0xff] }
  0x6b   : > { %2102 = vrot.lane.b32.xlu1 %v2071_v10, %s2495_s10  ;;  %v1826_v10 = vld [vmem:[%s2671_s26 + $0x159] sm:$0xff]  ;;  %v297_v27 = vld [vmem:[%s2671_s26 + $0xb1] sm:$0xff]  ;;  %v2857_v32 = vld [vmem:[%s2671_s26 + $0xa8] sm:$0xff] }
  0x6c   : > { %2097 = vrot.lane.b32.xlu0 %v2066_v3, %s2495_s10  ;;  %v2817_v3 = vld [vmem:[%s2671_s26 + $0x150] sm:$0xff]  ;;  %v2231_v22 = vpack.i.bf16 %v1826_v10, %v1825_v9  ;;  %v1829_v50 = vld [vmem:[%s2671_s26 + $0x181] sm:$0xff] }
  0x6d   : > { %v2211_v7 = vpack.i.bf16 %v2820_v4, %v2817_v3  ;;  %v2854_v31 = vld [vmem:[%s2671_s26 + $0x170] sm:$0xff] }
  0x6e   : > { %v2860_v33 = vld [vmem:[%s2671_s26 + $0xb0] sm:$0xff]  ;;  %v2261_v34 = vpack.i.bf16 %v2854_v31, %v2851_v30 }
  0x6f   : > { %2112 = vrot.lane.b32.xlu1 %v2111_v28, %s2495_s10  ;;  %v1830_v51 = vld [vmem:[%s2671_s26 + $0x189] sm:$0xff] }
  0x70   : > { %2107 = vrot.lane.b32.xlu0 %v2106_v29, %s2495_s10  ;;  %v2291_v52 = vpack.i.bf16 %v1830_v51, %v1829_v50 }
  0x73   : > { %2122 = vrot.lane.b32.xlu1 %v2111_v28, %s2493_s21  ;;  %v2251_v28 = vpack.i.bf16 %v313_v25, %v312_v24 }
  0x74   : > { %2117 = vrot.lane.b32.xlu0 %v2106_v29, %s2493_s21  ;;  %v2246_v29 = vpack.i.bf16 %v297_v27, %v296_v26 }
  0x77   : > { %2132 = vrot.lane.b32.xlu1 %v2131_v35, %s2493_s21 }
  0x78   : > { %2127 = vrot.lane.b32.xlu0 %v2126_v36, %s2493_s21 }
  0x7b   : > { %2142 = vrot.lane.b32.xlu1 %v2141_v41, %s2494_s23  ;;  %v1798_v41 = vld [vmem:[%s2671_s26 + $0x188] sm:$0xff] }
  0x7c   : > { %2137 = vrot.lane.b32.xlu0 %v2136_v42, %s2494_s23  ;;  %v1781_v42 = vld [vmem:[%s2671_s26 + $0xc0] sm:$0xff] }
  0x7f   : > { %2152 = vrot.lane.b32.xlu1 %v2151_v47, %s2494_s23  ;;  %v1782_v47 = vld [vmem:[%s2671_s26 + $0xc8] sm:$0xff] }
  0x80   : > { %2147 = vrot.lane.b32.xlu0 %v2146_v48, %s2494_s23  ;;  %v2266_v49 = vpack.i.bf16 %v1782_v47, %v1781_v42 }
  0x83   : > { %2162 = vrot.lane.b32.xlu1 %v2131_v35, %s2495_s10  ;;  %v2256_v35 = vpack.i.bf16 %v2860_v33, %v2857_v32 }
  0x84   : > { %2157 = vrot.lane.b32.xlu0 %v2126_v36, %s2495_s10  ;;  %v1797_v36 = vld [vmem:[%s2671_s26 + $0x180] sm:$0xff] }
  0x85   : > { %v2271_v48 = vpack.i.bf16 %v1798_v41, %v1797_v36 }
  0x87   : > { %2172 = vrot.lane.b32.xlu1 %v2171_v53, %s2495_s10 }
  0x88   : > { %2167 = vrot.lane.b32.xlu0 %v2166_v54, %s2495_s10 }
  0x8b   : > { %2182 = vrot.lane.b32.xlu1 %v2171_v53, %s2493_s21 }
  0x8c   : > { %2177 = vrot.lane.b32.xlu0 %v2166_v54, %s2493_s21 }
  0x8f   : > { %2192 = vrot.lane.b32.xlu1 %v2191_v59, %s2493_s21 }
  0x90   : > { %2187 = vrot.lane.b32.xlu0 %v2186_v60, %s2493_s21 }
  0x93   : > { %2202 = vrot.lane.b32.xlu1 %v2201_v1, %s2494_s23 }
  0x94   : > { %2197 = vrot.lane.b32.xlu0 %v2196_v2, %s2494_s23 }
  0x97   : > { %2212 = vrot.lane.b32.xlu1 %v2211_v7, %s2494_s23  ;;  %v250_v7 = vld [vmem:[%s2671_s26] sm:$0xff] }
  0x98   : > { %2207 = vrot.lane.b32.xlu0 %v2206_v8, %s2494_s23  ;;  %v251_v8 = vld [vmem:[%s2671_s26 + $0x8] sm:$0xff]  ;;  %s2359_s26 = sshll.u32 %s2497_s7, 4  ;;  %s2360_s26 = int_to_ptr.vmem [resolvable:$false] %s2359_s26 }
  0x99   : > { %p2362_p10 = scmp.lt.s32.totalorder %s3230_s12, %s2360_s26 }
  0x9b   : > { %2222 = vrot.lane.b32.xlu1 %v2191_v59, %s2495_s10 }
  0x9c   : > { %2217 = vrot.lane.b32.xlu0 %v2186_v60, %s2495_s10 }
  0x9f   : > { %2232 = vrot.lane.b32.xlu1 %v2231_v22, %s2495_s10 }
  0xa0   : > { %2227 = vrot.lane.b32.xlu0 %v2226_v23, %s2495_s10 }
  0xa3   : > { %2242 = vrot.lane.b32.xlu1 %v2231_v22, %s2493_s21 }
  0xa4   : > { %2237 = vrot.lane.b32.xlu0 %v2226_v23, %s2493_s21 }
  0xa7   : > { %2252 = vrot.lane.b32.xlu1 %v2251_v28, %s2493_s21 }
  0xa8   : > { %2247 = vrot.lane.b32.xlu0 %v2246_v29, %s2493_s21 }
  0xab   : > { %2262 = vrot.lane.b32.xlu1 %v2261_v34, %s2494_s23 }
  0xac   : > { %2257 = vrot.lane.b32.xlu0 %v2256_v35, %s2494_s23 }
  0xaf   : > { %2272 = vrot.lane.b32.xlu1 %v2271_v48, %s2494_s23 }
  0xb0   : > { %2267 = vrot.lane.b32.xlu0 %v2266_v49, %s2494_s23  ;;  %s2361_s23 = scalar_lea.vmem %s2360_s26, 4096 }
  0xb1   : > { %p2363_p13 = scmp.lt.s32.totalorder %s2361_s23, %s2355_s24 }
  0xb3   : > { %2282 = vrot.lane.b32.xlu1 %v2251_v28, %s2495_s10  ;;  %p2364_p3 = por %p2363_p13, %p2362_p10 }
  0xb4   : > { %2277 = vrot.lane.b32.xlu0 %v2246_v29, %s2495_s10 }
  0xb5   : > { %p2365_p7 = pnand %p2364_p3, %p2358_p8 }
  0xb7   : > { %2292 = vrot.lane.b32.xlu1 %v2291_v52, %s2495_s10 }
  0xb8   : > { %2287 = vrot.lane.b32.xlu0 %v2691_v11, %s2495_s10 }
  0xcd   : > { %v2068_v53 = vpop.permute.xlu1 %2067 }
  0xce   : > { %v2058_v54 = vpop.permute.xlu0 %2057  ;;  %v2070_v25 = vunpack.i.h.bf16 %v2068_v53  ;;  %v2069_v26 = vunpack.i.l.bf16 %v2068_v53 }
  0xcf   : > { %v2060_v59 = vunpack.i.h.bf16 %v2058_v54  ;;  %v2059_v60 = vunpack.i.l.bf16 %v2058_v54 }
  0xd1   : > { %v2073_v55 = vpop.permute.xlu1 %2072  ;;  %v764_v27 = vsel %vm763_vm0, %v250_v7, %v2059_v60  ;;  %v765_v28 = vsel %vm763_vm0, %v251_v8, %v2060_v59  ;;  %v766_v59 = vsel %vm763_vm0, %v2700_v14, %v2069_v26  ;;  %v767_v8 = vsel %vm763_vm0, %v2703_v15, %v2070_v25 }
  0xd2   : > { %v2063_v56 = vpop.permute.xlu0 %2062  ;;  %v2075_v9 = vunpack.i.h.bf16 %v2073_v55  ;;  %v2074_v10 = vunpack.i.l.bf16 %v2073_v55 }
  0xd3   : > { %v2065_v1 = vunpack.i.h.bf16 %v2063_v56  ;;  %v2064_v2 = vunpack.i.l.bf16 %v2063_v56 }
  0xd4   : > { %v782_v35 = vsel %vm763_vm0, %v2694_v12, %v2074_v10  ;;  %v783_v36 = vsel %vm763_vm0, %v2697_v13, %v2075_v9 }
  0xd5   : > { %v2083_v57 = vpop.permute.xlu1 %2082  ;;  %v780_v29 = vsel %vm763_vm0, %v1781_v42, %v2064_v2  ;;  %v781_v34 = vsel %vm763_vm0, %v1782_v47, %v2065_v1 }
  0xd6   : > { %v2078_v58 = vpop.permute.xlu0 %2077  ;;  %v2085_v16 = vunpack.i.h.bf16 %v2083_v57  ;;  %v2084_v17 = vunpack.i.l.bf16 %v2083_v57 }
  0xd7   : > { %v2080_v23 = vunpack.i.h.bf16 %v2078_v58  ;;  %v2079_v11 = vunpack.i.l.bf16 %v2078_v58 }
  0xd8   : > { %v813_v48 = vsel %vm796_vm1, %v780_v29, %v2084_v17  ;;  %v814_v49 = vsel %vm796_vm1, %v781_v34, %v2085_v16 }
  0xd9   : > { %v2093_v22 = vpop.permute.xlu1 %2092  ;;  %v797_v53 = vsel %vm796_vm1, %v764_v27, %v2079_v11  ;;  %v798_v42 = vsel %vm796_vm1, %v765_v28, %v2080_v23 }
  0xda   : > { %v2088_v24 = vpop.permute.xlu0 %2087  ;;  %v2095_v54 = vunpack.i.h.bf16 %v2093_v22  ;;  %v2094_v47 = vunpack.i.l.bf16 %v2093_v22 }
  0xdb   : > { %v2090_v12 = vunpack.i.h.bf16 %v2088_v24  ;;  %v2089_v57 = vunpack.i.l.bf16 %v2088_v24 }
  0xdc   : > { %v815_v22 = vsel %vm796_vm1, %v782_v35, %v2094_v47  ;;  %v816_v23 = vsel %vm796_vm1, %v783_v36, %v2095_v54 }
  0xdd   : > { %v2103_v41 = vpop.permute.xlu1 %2102  ;;  %v799_v14 = vsel %vm796_vm1, %v766_v59, %v2089_v57  ;;  %v800_v26 = vsel %vm796_vm1, %v767_v8, %v2090_v12 }
  0xde   : > { %v2105_v50 = vunpack.i.h.bf16 %v2103_v41  ;;  %v2104_v51 = vunpack.i.l.bf16 %v2103_v41  ;;  %v2098_v52 = vpop.permute.xlu0 %2097 }
  0xdf   : > { %v2100_v55 = vunpack.i.h.bf16 %v2098_v52  ;;  %v2099_v56 = vunpack.i.l.bf16 %v2098_v52 }
  0xe0   : > { %v846_v13 = vsel %vm829_vm2, %v813_v48, %v2104_v51  ;;  %v847_v58 = vsel %vm829_vm2, %v814_v49, %v2105_v50 }
  0xe1   : > { %v2113_v60 = vpop.permute.xlu1 %2112  ;;  %v830_v1 = vsel %vm829_vm2, %v797_v53, %v2099_v56  ;;  %v831_v2 = vsel %vm829_vm2, %v798_v42, %v2100_v55  ;;  %v870_v7 = vpack.c.bf16 %v847_v58, %v846_v13 }
  0xe2   : > { %v2115_v9 = vunpack.i.h.bf16 %v2113_v60  ;;  %v2114_v10 = vunpack.i.l.bf16 %v2113_v60  ;;  %v2108_v16 = vpop.permute.xlu0 %2107  ;;  %v862_v17 = vpack.c.bf16 %v831_v2, %v830_v1 }
  0xe3   : > { %v2110_v11 = vunpack.i.h.bf16 %v2108_v16  ;;  %v2109_v24 = vunpack.i.l.bf16 %v2108_v16  ;;  %1959 = vmatprep.mubr.msk.bf16.mxu1 %vm886_vm3, %v870_v7 }
  0xe4   : > { %v848_v27 = vsel %vm829_vm2, %v815_v22, %v2114_v10  ;;  %v849_v15 = vsel %vm829_vm2, %v816_v23, %v2115_v9  ;;  %1943 = vmatprep.mubr.msk.bf16.mxu0 %vm886_vm3, %v862_v17 }
  0xe5   : > { %v871_v25 = vpack.c.bf16 %v849_v15, %v848_v27  ;;  %v832_v28 = vsel %vm829_vm2, %v799_v14, %v2109_v24  ;;  %v833_v29 = vsel %vm829_vm2, %v800_v26, %v2110_v11  ;;  %v2123_v34 = vpop.permute.xlu1 %2122 }
  0xe6   : > { %v863_v35 = vpack.c.bf16 %v833_v29, %v832_v28  ;;  %v2118_v36 = vpop.permute.xlu0 %2117  ;;  %v2125_v50 = vunpack.i.h.bf16 %v2123_v34  ;;  %v2124_v51 = vunpack.i.l.bf16 %v2123_v34 }
  0xe7   : > { %1960 = vmatmul.mubr.msk.bf16.vlgmr.msra.gmra.mrb[0].mxu1 %vm886_vm3, %v871_v25  ;;  %v2120_v53 = vunpack.i.h.bf16 %v2118_v36  ;;  %v2119_v42 = vunpack.i.l.bf16 %v2118_v36 }
  0xe8   : > { %1944 = vmatmul.mubr.msk.bf16.vlgmr.msra.gmra.mrb[0].mxu0 %vm886_vm3, %v863_v35  ;;  %v784_v57 = vsel %vm763_vm0, %v2713_v18, %v2124_v51  ;;  %v785_v13 = vsel %vm763_vm0, %v2716_v19, %v2125_v50 }
  0xe9   : > { %v2133_v41 = vpop.permute.xlu1 %2132  ;;  %v768_v1 = vsel %vm763_vm0, %v2719_v20, %v2119_v42  ;;  %v769_v2 = vsel %vm763_vm0, %v2722_v21, %v2120_v53 }
  0xea   : > { %v2128_v48 = vpop.permute.xlu0 %2127  ;;  %v2135_v54 = vunpack.i.h.bf16 %v2133_v41  ;;  %v2134_v47 = vunpack.i.l.bf16 %v2133_v41 }
  0xeb   : > { %v2130_v7 = vunpack.i.h.bf16 %v2128_v48  ;;  %v2129_v8 = vunpack.i.l.bf16 %v2128_v48 }
  0xec   : > { %v786_v9 = vsel %vm763_vm0, %v2747_v37, %v2134_v47  ;;  %v787_v18 = vsel %vm763_vm0, %v2750_v38, %v2135_v54 }
  0xed   : > { %v2143_v49 = vpop.permute.xlu1 %2142  ;;  %v770_v25 = vsel %vm763_vm0, %v2753_v39, %v2129_v8  ;;  %v771_v36 = vsel %vm763_vm0, %v2756_v40, %v2130_v7 }
  0xee   : > { %v2138_v52 = vpop.permute.xlu0 %2137  ;;  %v2145_v55 = vunpack.i.h.bf16 %v2143_v49  ;;  %v2144_v56 = vunpack.i.l.bf16 %v2143_v49 }
  0xef   : > { %v2140_v58 = vunpack.i.h.bf16 %v2138_v52  ;;  %v2139_v59 = vunpack.i.l.bf16 %v2138_v52 }
  0xf0   : > { %v817_v10 = vsel %vm796_vm1, %v784_v57, %v2144_v56  ;;  %v818_v19 = vsel %vm796_vm1, %v785_v13, %v2145_v55 }
  0xf1   : > { %v2153_v12 = vpop.permute.xlu1 %2152  ;;  %v801_v17 = vsel %vm796_vm1, %v768_v1, %v2139_v59  ;;  %v802_v20 = vsel %vm796_vm1, %v769_v2, %v2140_v58 }
  0xf2   : > { %v2148_v60 = vpop.permute.xlu0 %2147  ;;  %v2155_v11 = vunpack.i.h.bf16 %v2153_v12  ;;  %v2154_v24 = vunpack.i.l.bf16 %v2153_v12 }
  0xf3   : > { %v2150_v37 = vunpack.i.h.bf16 %v2148_v60  ;;  %v2149_v27 = vunpack.i.l.bf16 %v2148_v60 }
  0xf4   : > { %v819_v51 = vsel %vm796_vm1, %v786_v9, %v2154_v24  ;;  %v820_v52 = vsel %vm796_vm1, %v787_v18, %v2155_v11 }
  0xf5   : > { %v2163_v16 = vpop.permute.xlu1 %2162  ;;  %v803_v39 = vsel %vm796_vm1, %v770_v25, %v2149_v27  ;;  %v804_v54 = vsel %vm796_vm1, %v771_v36, %v2150_v37 }
  0xf6   : > { %v2165_v22 = vunpack.i.h.bf16 %v2163_v16  ;;  %v2164_v23 = vunpack.i.l.bf16 %v2163_v16  ;;  %v2158_v21 = vpop.permute.xlu0 %2157 }
  0xf7   : > { %v2160_v14 = vunpack.i.h.bf16 %v2158_v21  ;;  %v2159_v26 = vunpack.i.l.bf16 %v2158_v21 }
  0xf8   : > { %v850_v38 = vsel %vm829_vm2, %v817_v10, %v2164_v23  ;;  %v851_v15 = vsel %vm829_vm2, %v818_v19, %v2165_v22 }
  0xf9   : > { %v872_v28 = vpack.c.bf16 %v851_v15, %v850_v38  ;;  %v834_v29 = vsel %vm829_vm2, %v801_v17, %v2159_v26  ;;  %v835_v34 = vsel %vm829_vm2, %v802_v20, %v2160_v14  ;;  %v2173_v35 = vpop.permute.xlu1 %2172 }
  0xfa   : > { %v864_v41 = vpack.c.bf16 %v835_v34, %v834_v29  ;;  %v2175_v48 = vunpack.i.h.bf16 %v2173_v35  ;;  %v2174_v49 = vunpack.i.l.bf16 %v2173_v35  ;;  %v2168_v50 = vpop.permute.xlu0 %2167 }
  0xfb   : > { %v2170_v53 = vunpack.i.h.bf16 %v2168_v50  ;;  %v2169_v42 = vunpack.i.l.bf16 %v2168_v50  ;;  %1963 = vmatprep.mubr.msk.bf16.mxu1 %vm886_vm3, %v872_v28 }
  0xfc   : > { %v852_v47 = vsel %vm829_vm2, %v819_v51, %v2174_v49  ;;  %v853_v40 = vsel %vm829_vm2, %v820_v52, %v2175_v48  ;;  %1947 = vmatprep.mubr.msk.bf16.mxu0 %vm886_vm3, %v864_v41 }
  0xfd   : > { %v873_v55 = vpack.c.bf16 %v853_v40, %v852_v47  ;;  %v836_v56 = vsel %vm829_vm2, %v803_v39, %v2169_v42  ;;  %v837_v12 = vsel %vm829_vm2, %v804_v54, %v2170_v53  ;;  %v2183_v57 = vpop.permute.xlu1 %2182 }
  0xfe   : > { %v865_v13 = vpack.c.bf16 %v837_v12, %v836_v56  ;;  %v2178_v58 = vpop.permute.xlu0 %2177  ;;  %v2185_v2 = vunpack.i.h.bf16 %v2183_v57  ;;  %v2184_v7 = vunpack.i.l.bf16 %v2183_v57 }
  0xff   : > { %1964 = vmatmul.mubr.msk.bf16.gmra.mrb[4].mxu1 %vm886_vm3, %v873_v55  ;;  %v2180_v9 = vunpack.i.h.bf16 %v2178_v58  ;;  %v2179_v18 = vunpack.i.l.bf16 %v2178_v58 }
 0x100   : > { %1948 = vmatmul.mubr.msk.bf16.gmra.mrb[4].mxu0 %vm886_vm3, %v865_v13  ;;  %v788_v22 = vsel %vm763_vm0, %v2765_v43, %v2184_v7  ;;  %v789_v23 = vsel %vm763_vm0, %v2768_v44, %v2185_v2 }
 0x101   : > { %v2193_v59 = vpop.permute.xlu1 %2192  ;;  %v772_v14 = vsel %vm763_vm0, %v2771_v45, %v2179_v18  ;;  %v773_v26 = vsel %vm763_vm0, %v2774_v46, %v2180_v9 }
 0x102   : > { %v2188_v60 = vpop.permute.xlu0 %2187  ;;  %v2195_v10 = vunpack.i.h.bf16 %v2193_v59  ;;  %v2194_v19 = vunpack.i.l.bf16 %v2193_v59 }
 0x103   : > { %v2190_v37 = vunpack.i.h.bf16 %v2188_v60  ;;  %v2189_v27 = vunpack.i.l.bf16 %v2188_v60 }
 0x104   : > { %v790_v38 = vsel %vm763_vm0, %v2799_v61, %v2194_v19  ;;  %v791_v43 = vsel %vm763_vm0, %v2802_v62, %v2195_v10 }
 0x105   : > { %v2203_v1 = vpop.permute.xlu1 %2202  ;;  %v774_v51 = vsel %vm763_vm0, %v2805_v63, %v2189_v27  ;;  %v775_v54 = vsel %vm763_vm0, %v2808_v0, %v2190_v37 }
 0x106   : > { %v2198_v8 = vpop.permute.xlu0 %2197  ;;  %v2205_v16 = vunpack.i.h.bf16 %v2203_v1  ;;  %v2204_v17 = vunpack.i.l.bf16 %v2203_v1 }
 0x107   : > { %v2200_v21 = vunpack.i.h.bf16 %v2198_v8  ;;  %v2199_v11 = vunpack.i.l.bf16 %v2198_v8 }
 0x108   : > { %v821_v15 = vsel %vm796_vm1, %v788_v22, %v2204_v17  ;;  %v822_v44 = vsel %vm796_vm1, %v789_v23, %v2205_v16 }
 0x109   : > { %v2213_v20 = vpop.permute.xlu1 %2212  ;;  %v805_v28 = vsel %vm796_vm1, %v772_v14, %v2199_v11  ;;  %v806_v45 = vsel %vm796_vm1, %v773_v26, %v2200_v21 }
 0x10a   : > { %v2208_v24 = vpop.permute.xlu0 %2207  ;;  %v2215_v35 = vunpack.i.h.bf16 %v2213_v20  ;;  %v2214_v36 = vunpack.i.l.bf16 %v2213_v20 }
 0x10b   : > { %v2210_v61 = vunpack.i.h.bf16 %v2208_v24  ;;  %v2209_v49 = vunpack.i.l.bf16 %v2208_v24 }
 0x10c   : > { %v823_v12 = vsel %vm796_vm1, %v790_v38, %v2214_v36  ;;  %v824_v57 = vsel %vm796_vm1, %v791_v43, %v2215_v35 }
 0x10d   : > { %v2223_v25 = vpop.permute.xlu1 %2222  ;;  %v807_v63 = vsel %vm796_vm1, %v774_v51, %v2209_v49  ;;  %v808_v59 = vsel %vm796_vm1, %v775_v54, %v2210_v61 }
 0x10e   : > { %v2225_v29 = vunpack.i.h.bf16 %v2223_v25  ;;  %v2224_v34 = vunpack.i.l.bf16 %v2223_v25  ;;  %v2218_v46 = vpop.permute.xlu0 %2217 }
 0x10f   : > { %v2220_v41 = vunpack.i.h.bf16 %v2218_v46  ;;  %v2219_v48 = vunpack.i.l.bf16 %v2218_v46 }
 0x110   : > { %v854_v62 = vsel %vm829_vm2, %v821_v15, %v2224_v34  ;;  %v855_v50 = vsel %vm829_vm2, %v822_v44, %v2225_v29 }
 0x111   : > { %v874_v52 = vpack.c.bf16 %v855_v50, %v854_v62  ;;  %v838_v53 = vsel %vm829_vm2, %v805_v28, %v2219_v48  ;;  %v839_v42 = vsel %vm829_vm2, %v806_v45, %v2220_v41  ;;  %v2233_v39 = vpop.permute.xlu1 %2232 }
 0x112   : > { %v866_v47 = vpack.c.bf16 %v839_v42, %v838_v53  ;;  %v2235_v40 = vunpack.i.h.bf16 %v2233_v39  ;;  %v2234_v55 = vunpack.i.l.bf16 %v2233_v39  ;;  %v2228_v56 = vpop.permute.xlu0 %2227 }
 0x113   : > { %v2230_v13 = vunpack.i.h.bf16 %v2228_v56  ;;  %v2229_v58 = vunpack.i.l.bf16 %v2228_v56  ;;  %1967 = vmatprep.mubr.msk.bf16.mxu1 %vm886_vm3, %v874_v52 }
 0x114   : > { %v856_v60 = vsel %vm829_vm2, %v823_v12, %v2234_v55  ;;  %v857_v0 = vsel %vm829_vm2, %v824_v57, %v2235_v40  ;;  %1951 = vmatprep.mubr.msk.bf16.mxu0 %vm886_vm3, %v866_v47 }
 0x115   : > { %v875_v1 = vpack.c.bf16 %v857_v0, %v856_v60  ;;  %v840_v2 = vsel %vm829_vm2, %v807_v63, %v2229_v58  ;;  %v841_v7 = vsel %vm829_vm2, %v808_v59, %v2230_v13  ;;  %v2243_v8 = vpop.permute.xlu1 %2242 }
 0x116   : > { %v867_v9 = vpack.c.bf16 %v841_v7, %v840_v2  ;;  %v2238_v18 = vpop.permute.xlu0 %2237  ;;  %v2245_v17 = vunpack.i.h.bf16 %v2243_v8  ;;  %v2244_v20 = vunpack.i.l.bf16 %v2243_v8 }
 0x117   : > { %1968 = vmatmul.mubr.msk.bf16.gmra.mrb[8].mxu1 %vm886_vm3, %v875_v1  ;;  %v2240_v23 = vunpack.i.h.bf16 %v2238_v18  ;;  %v2239_v21 = vunpack.i.l.bf16 %v2238_v18 }
 0x118   : > { %1952 = vmatmul.mubr.msk.bf16.gmra.mrb[8].mxu0 %vm886_vm3, %v867_v9  ;;  %v792_v27 = vsel %vm763_vm0, %v2817_v3, %v2244_v20  ;;  %v793_v38 = vsel %vm763_vm0, %v2820_v4, %v2245_v17 }
 0x119   : > { %v2253_v10 = vpop.permute.xlu1 %2252  ;;  %v776_v25 = vsel %vm763_vm0, %v2823_v5, %v2239_v21  ;;  %v777_v28 = vsel %vm763_vm0, %v2826_v6, %v2240_v23 }
 0x11a   : > { %v2248_v19 = vpop.permute.xlu0 %2247  ;;  %v2255_v11 = vunpack.i.h.bf16 %v2253_v10  ;;  %v2254_v24 = vunpack.i.l.bf16 %v2253_v10 }
 0x11b   : > { %v2250_v45 = vunpack.i.h.bf16 %v2248_v19  ;;  %v2249_v29 = vunpack.i.l.bf16 %v2248_v19 }
 0x11c   : > { %v794_v34 = vsel %vm763_vm0, %v2851_v30, %v2254_v24  ;;  %v795_v3 = vsel %vm763_vm0, %v2854_v31, %v2255_v11 }
 0x11d   : > { %v2263_v16 = vpop.permute.xlu1 %2262  ;;  %v778_v53 = vsel %vm763_vm0, %v2857_v32, %v2249_v29  ;;  %v779_v40 = vsel %vm763_vm0, %v2860_v33, %v2250_v45 }
 0x11e   : > { %v2258_v22 = vpop.permute.xlu0 %2257  ;;  %v2265_v14 = vunpack.i.h.bf16 %v2263_v16  ;;  %v2264_v26 = vunpack.i.l.bf16 %v2263_v16 }
 0x11f   : > { %v2260_v43 = vunpack.i.h.bf16 %v2258_v22  ;;  %v2259_v15 = vunpack.i.l.bf16 %v2258_v22 }
 0x120   : > { %v825_v46 = vsel %vm796_vm1, %v792_v27, %v2264_v26  ;;  %v826_v4 = vsel %vm796_vm1, %v793_v38, %v2265_v14 }
 0x121   : > { %v2273_v37 = vpop.permute.xlu1 %2272  ;;  %v809_v36 = vsel %vm796_vm1, %v776_v25, %v2259_v15  ;;  %v810_v5 = vsel %vm796_vm1, %v777_v28, %v2260_v43 }
 0x122   : > { %v2268_v44 = vpop.permute.xlu0 %2267  ;;  %v2275_v61 = vunpack.i.h.bf16 %v2273_v37  ;;  %v2274_v49 = vunpack.i.l.bf16 %v2273_v37 }
 0x123   : > { %v2270_v30 = vunpack.i.h.bf16 %v2268_v44  ;;  %v2269_v51 = vunpack.i.l.bf16 %v2268_v44 }
 0x124   : > { %v827_v13 = vsel %vm796_vm1, %v794_v34, %v2274_v49  ;;  %v828_v58 = vsel %vm796_vm1, %v795_v3, %v2275_v61 }
 0x125   : > { %v2283_v35 = vpop.permute.xlu1 %2282  ;;  %v811_v59 = vsel %vm796_vm1, %v778_v53, %v2269_v51  ;;  %v812_v60 = vsel %vm796_vm1, %v779_v40, %v2270_v30 }
 0x126   : > { %v2285_v41 = vunpack.i.h.bf16 %v2283_v35  ;;  %v2284_v48 = vunpack.i.l.bf16 %v2283_v35  ;;  %v2278_v6 = vpop.permute.xlu0 %2277 }
 0x127   : > { %v2280_v62 = vunpack.i.h.bf16 %v2278_v6  ;;  %v2279_v50 = vunpack.i.l.bf16 %v2278_v6 }
 0x128   : > { %v858_v31 = vsel %vm829_vm2, %v825_v46, %v2284_v48  ;;  %v859_v52 = vsel %vm829_vm2, %v826_v4, %v2285_v41 }
 0x129   : > { %v876_v42 = vpack.c.bf16 %v859_v52, %v858_v31  ;;  %v842_v39 = vsel %vm829_vm2, %v809_v36, %v2279_v50  ;;  %v843_v54 = vsel %vm829_vm2, %v810_v5, %v2280_v62  ;;  %v2293_v47 = vpop.permute.xlu1 %2292 }
 0x12a   : > { %v868_v55 = vpack.c.bf16 %v843_v54, %v842_v39  ;;  %v2295_v56 = vunpack.i.h.bf16 %v2293_v47  ;;  %v2294_v12 = vunpack.i.l.bf16 %v2293_v47  ;;  %v2288_v57 = vpop.permute.xlu0 %2287 }
 0x12b   : > { %v2290_v63 = vunpack.i.h.bf16 %v2288_v57  ;;  %v2289_v32 = vunpack.i.l.bf16 %v2288_v57  ;;  %1971 = vmatprep.mubr.msk.bf16.mxu1 %vm886_vm3, %v876_v42 }
 0x12c   : > { %v860_v0 = vsel %vm829_vm2, %v827_v13, %v2294_v12  ;;  %v861_v33 = vsel %vm829_vm2, %v828_v58, %v2295_v56  ;;  %1955 = vmatprep.mubr.msk.bf16.mxu0 %vm886_vm3, %v868_v55 }
 0x12d   : > { %v877_v1 = vpack.c.bf16 %v861_v33, %v860_v0  ;;  %v844_v2 = vsel %vm829_vm2, %v811_v59, %v2289_v32  ;;  %v845_v7 = vsel %vm829_vm2, %v812_v60, %v2290_v63 }
 0x12e   : > { %v869_v8 = vpack.c.bf16 %v845_v7, %v844_v2 }
 0x12f   : > { %1972 = vmatmul.mubr.msk.bf16.gmra.mrb[12].mxu1 %vm886_vm3, %v877_v1 }
 0x130   : > { %1956 = vmatmul.mubr.msk.bf16.gmra.mrb[12].mxu0 %vm886_vm3, %v869_v8 }
 0x1ba   : > { %v3026_v9 = vpop.f32.mrb[0].mxu1 }
 0x1bb   : > { %v1945_v18 = vpop.f32.mrb[0].mxu0  ;;  %v1908_v10 = vpack.c.bf16 %v3026_v9, %v3026_v9  ;;  %v3030_v19 = vpop.f32.mrb[1].mxu1 }
 0x1bc   : > { %v1892_v16 = vpack.c.bf16 %v1945_v18, %v1945_v18  ;;  %v969_v17 = vpop.f32.mrb[1].mxu0  ;;  %v1906_v20 = vpack.c.bf16 %v3030_v19, %v3030_v19  ;;  %v3034_v22 = vpop.f32.mrb[2].mxu1  ;;  %v1460_v43 = vmul.f32 %v1945_v18, %v1945_v18  ;;  %v1390_v45 = vsel %vm1386_vm5, %v1945_v18, 0.0 }
 0x1bd   : > { %1243 = vst.msk [vmem:[%s3038_s29 + $0x48] sm:$0xf] %vm1224_vm4, %v1908_v10  ;;  %v1890_v23 = vpack.c.bf16 %v969_v17, %v969_v17  ;;  %v1946_v21 = vpop.f32.mrb[2].mxu0  ;;  %v3042_v11 = vpop.f32.mrb[3].mxu1  ;;  %v1909_v26 = vpack.c.bf16 %v3034_v22, %v3034_v22  ;;  %v1458_v37 = vmul.f32 %v969_v17, %v969_v17  ;;  %v1387_v15 = vsel %vm1386_vm5, %v969_v17, 0.0 }
 0x1be   : > { %1227 = vst.msk [vmem:[%s3038_s29 + $0x8] sm:$0xf] %vm1224_vm4, %v1892_v16  ;;  %1241 = vst.msk [vmem:[%s3038_s29 + $0x40] sm:$0xf] %vm1224_vm4, %v1906_v20  ;;  %v1893_v24 = vpack.c.bf16 %v1946_v21, %v1946_v21  ;;  %1261 = vrot.lane.b32.xlu0 %v1892_v16, %s2496_s11  ;;  %v972_v14 = vpop.f32.mrb[3].mxu0  ;;  %v1907_v27 = vpack.c.bf16 %v3042_v11, %v3042_v11  ;;  %v1461_v34 = vmul.f32 %v1946_v21, %v1946_v21 }
 0x1bf   : > { %1225 = vst.msk [vmem:[%s3038_s29] sm:$0xf] %vm1224_vm4, %v1890_v23  ;;  %1244 = vst.msk [vmem:[%s3038_s29 + $0x4c] sm:$0xf] %vm1224_vm4, %v1909_v26  ;;  %v1891_v38 = vpack.c.bf16 %v972_v14, %v972_v14  ;;  %v1388_v44 = vsel %vm1386_vm5, %v972_v14, 0.0  ;;  %v1459_v25 = vmul.f32 %v972_v14, %v972_v14  ;;  %v1490_v29 = vsel %vm1386_vm5, %v1458_v37, 0.0 }
 0x1c0   : > { %1228 = vst.msk [vmem:[%s3038_s29 + $0xc] sm:$0xf] %vm1224_vm4, %v1893_v24  ;;  %1263 = vrot.lane.b32.xlu1 %v1893_v24, %s2496_s11  ;;  %1242 = vst.msk [vmem:[%s3038_s29 + $0x44] sm:$0xf] %vm1224_vm4, %v1907_v27  ;;  %v1389_v28 = vadd.f32 %v1388_v44, %v1387_v15  ;;  %v1493_v35 = vsel %vm1386_vm5, %v1460_v43, 0.0  ;;  %v1392_v36 = vsel %vm1386_vm5, %v1946_v21, 0.0 }
 0x1c1   : > { %1226 = vst.msk [vmem:[%s3038_s29 + $0x4] sm:$0xf] %vm1224_vm4, %v1891_v38  ;;  %v1491_v3 = vsel %vm1386_vm5, %v1459_v25, 0.0  ;;  %v1495_v48 = vsel %vm1386_vm5, %v1461_v34, 0.0 }
 0x1c2   : > { %1293 = vrot.lane.b32.xlu0 %v1908_v10, %s2496_s11  ;;  %v1391_v46 = vadd.f32 %v1390_v45, %v1389_v28  ;;  %v1492_v4 = vadd.f32 %v1491_v3, %v1490_v29 }
 0x1c4   : > { %1295 = vrot.lane.b32.xlu1 %v1909_v26, %s2496_s11  ;;  %v1494_v5 = vadd.f32 %v1493_v35, %v1492_v4  ;;  %v1393_v41 = vadd.f32 %v1392_v36, %v1391_v46 }
 0x1c6   : > { %1257 = vrot.lane.b32.xlu0 %v1890_v23, %s2496_s11  ;;  %v1496_v6 = vadd.f32 %v1495_v48, %v1494_v5 }
 0x1c8   : > { %1259 = vrot.lane.b32.xlu1 %v1891_v38, %s2496_s11 }
 0x1ca   : > { %1289 = vrot.lane.b32.xlu0 %v1906_v20, %s2496_s11 }
 0x1cc   : > { %1291 = vrot.lane.b32.xlu1 %v1907_v27, %s2496_s11 }
 0x1d2   : > { %v3078_v61 = vpop.f32.mrb[4].mxu1 }
 0x1d3   : > { %v1949_v49 = vpop.f32.mrb[4].mxu0  ;;  %v1912_v62 = vpack.c.bf16 %v3078_v61, %v3078_v61  ;;  %v3082_v50 = vpop.f32.mrb[5].mxu1 }
 0x1d4   : > { %v1896_v30 = vpack.c.bf16 %v1949_v49, %v1949_v49  ;;  %v985_v51 = vpop.f32.mrb[5].mxu0  ;;  %v1910_v31 = vpack.c.bf16 %v3082_v50, %v3082_v50  ;;  %v3086_v52 = vpop.f32.mrb[6].mxu1  ;;  %v1464_v63 = vmul.f32 %v1949_v49, %v1949_v49  ;;  %v1398_v33 = vsel %vm1386_vm5, %v1949_v49, 0.0 }
 0x1d5   : > { %1247 = vst.msk [vmem:[%s3038_s29 + $0x58] sm:$0xf] %vm1224_vm4, %v1912_v62  ;;  %v1894_v53 = vpack.c.bf16 %v985_v51, %v985_v51  ;;  %v1394_v42 = vsel %vm1386_vm5, %v985_v51, 0.0  ;;  %v1462_v39 = vmul.f32 %v985_v51, %v985_v51  ;;  %v1950_v54 = vpop.f32.mrb[6].mxu0  ;;  %v3091_v47 = vpop.f32.mrb[7].mxu1  ;;  %v1913_v13 = vpack.c.bf16 %v3086_v52, %v3086_v52 }
 0x1d6   : > { %1231 = vst.msk [vmem:[%s3038_s29 + $0x18] sm:$0xf] %vm1224_vm4, %v1896_v30  ;;  %v1395_v40 = vadd.f32 %v1394_v42, %v1393_v41  ;;  %1245 = vst.msk [vmem:[%s3038_s29 + $0x50] sm:$0xf] %vm1224_vm4, %v1910_v31  ;;  %1269 = vrot.lane.b32.xlu0 %v1896_v30, %s2496_s11  ;;  %v988_v55 = vpop.f32.mrb[7].mxu0  ;;  %v1897_v12 = vpack.c.bf16 %v1950_v54, %v1950_v54  ;;  %v1911_v58 = vpack.c.bf16 %v3091_v47, %v3091_v47 }
 0x1d7   : > { %1229 = vst.msk [vmem:[%s3038_s29 + $0x10] sm:$0xf] %vm1224_vm4, %v1894_v53  ;;  %v1497_v56 = vsel %vm1386_vm5, %v1462_v39, 0.0  ;;  %1248 = vst.msk [vmem:[%s3038_s29 + $0x5c] sm:$0xf] %vm1224_vm4, %v1913_v13  ;;  %v1895_v32 = vpack.c.bf16 %v988_v55, %v988_v55  ;;  %v1396_v59 = vsel %vm1386_vm5, %v988_v55, 0.0  ;;  %v1463_v60 = vmul.f32 %v988_v55, %v988_v55 }
 0x1d8   : > { %v1498_v57 = vadd.f32 %v1497_v56, %v1496_v6  ;;  %1232 = vst.msk [vmem:[%s3038_s29 + $0x1c] sm:$0xf] %vm1224_vm4, %v1897_v12  ;;  %1271 = vrot.lane.b32.xlu1 %v1897_v12, %s2496_s11  ;;  %1246 = vst.msk [vmem:[%s3038_s29 + $0x54] sm:$0xf] %vm1224_vm4, %v1911_v58  ;;  %v1397_v0 = vadd.f32 %v1396_v59, %v1395_v40  ;;  %v1465_v1 = vmul.f32 %v1950_v54, %v1950_v54 }
 0x1d9   : > { %1230 = vst.msk [vmem:[%s3038_s29 + $0x14] sm:$0xf] %vm1224_vm4, %v1895_v32  ;;  %v1499_v2 = vsel %vm1386_vm5, %v1463_v60, 0.0  ;;  %v1501_v18 = vsel %vm1386_vm5, %v1464_v63, 0.0  ;;  %v1400_v10 = vsel %vm1386_vm5, %v1950_v54, 0.0 }
 0x1da   : > { %1301 = vrot.lane.b32.xlu0 %v1912_v62, %s2496_s11  ;;  %v1399_v7 = vadd.f32 %v1398_v33, %v1397_v0  ;;  %v1500_v8 = vadd.f32 %v1499_v2, %v1498_v57  ;;  %v1503_v20 = vsel %vm1386_vm5, %v1465_v1, 0.0 }
 0x1dc   : > { %1303 = vrot.lane.b32.xlu1 %v1913_v13, %s2496_s11  ;;  %v1502_v16 = vadd.f32 %v1501_v18, %v1500_v8  ;;  %v1401_v17 = vadd.f32 %v1400_v10, %v1399_v7 }
 0x1de   : > { %1265 = vrot.lane.b32.xlu0 %v1894_v53, %s2496_s11  ;;  %v1504_v23 = vadd.f32 %v1503_v20, %v1502_v16 }
 0x1e0   : > { %1267 = vrot.lane.b32.xlu1 %v1895_v32, %s2496_s11 }
 0x1e2   : > { %1297 = vrot.lane.b32.xlu0 %v1910_v31, %s2496_s11 }
 0x1e4   : > { %1299 = vrot.lane.b32.xlu1 %v1911_v58, %s2496_s11 }
 0x1ea   : > { %v3126_v21 = vpop.f32.mrb[8].mxu1 }
 0x1eb   : > { %v1953_v24 = vpop.f32.mrb[8].mxu0  ;;  %v1916_v14 = vpack.c.bf16 %v3126_v21, %v3126_v21  ;;  %v3130_v26 = vpop.f32.mrb[9].mxu1 }
 0x1ec   : > { %v1900_v37 = vpack.c.bf16 %v1953_v24, %v1953_v24  ;;  %v1001_v27 = vpop.f32.mrb[9].mxu0  ;;  %v1914_v38 = vpack.c.bf16 %v3130_v26, %v3130_v26  ;;  %v3134_v43 = vpop.f32.mrb[10].mxu1  ;;  %v1468_v5 = vmul.f32 %v1953_v24, %v1953_v24  ;;  %v1406_v62 = vsel %vm1386_vm5, %v1953_v24, 0.0 }
 0x1ed   : > { %1251 = vst.msk [vmem:[%s3038_s29 + $0x68] sm:$0xf] %vm1224_vm4, %v1916_v14  ;;  %v1898_v15 = vpack.c.bf16 %v1001_v27, %v1001_v27  ;;  %v1402_v44 = vsel %vm1386_vm5, %v1001_v27, 0.0  ;;  %v1466_v25 = vmul.f32 %v1001_v27, %v1001_v27  ;;  %v1954_v28 = vpop.f32.mrb[10].mxu0  ;;  %v3139_v45 = vpop.f32.mrb[11].mxu1  ;;  %v1917_v35 = vpack.c.bf16 %v3134_v43, %v3134_v43 }
 0x1ee   : > { %1235 = vst.msk [vmem:[%s3038_s29 + $0x28] sm:$0xf] %vm1224_vm4, %v1900_v37  ;;  %v1403_v29 = vadd.f32 %v1402_v44, %v1401_v17  ;;  %1249 = vst.msk [vmem:[%s3038_s29 + $0x60] sm:$0xf] %vm1224_vm4, %v1914_v38  ;;  %1277 = vrot.lane.b32.xlu0 %v1900_v37, %s2496_s11  ;;  %v1004_v34 = vpop.f32.mrb[11].mxu0  ;;  %v1901_v46 = vpack.c.bf16 %v1954_v28, %v1954_v28  ;;  %v1915_v36 = vpack.c.bf16 %v3139_v45, %v3139_v45 }
 0x1ef   : > { %1233 = vst.msk [vmem:[%s3038_s29 + $0x20] sm:$0xf] %vm1224_vm4, %v1898_v15  ;;  %v1505_v3 = vsel %vm1386_vm5, %v1466_v25, 0.0  ;;  %1252 = vst.msk [vmem:[%s3038_s29 + $0x6c] sm:$0xf] %vm1224_vm4, %v1917_v35  ;;  %v1899_v41 = vpack.c.bf16 %v1004_v34, %v1004_v34  ;;  %v1404_v48 = vsel %vm1386_vm5, %v1004_v34, 0.0  ;;  %v1467_v6 = vmul.f32 %v1004_v34, %v1004_v34 }
 0x1f0   : > { %v1506_v4 = vadd.f32 %v1505_v3, %v1504_v23  ;;  %1236 = vst.msk [vmem:[%s3038_s29 + $0x2c] sm:$0xf] %vm1224_vm4, %v1901_v46  ;;  %1279 = vrot.lane.b32.xlu1 %v1901_v46, %s2496_s11  ;;  %1250 = vst.msk [vmem:[%s3038_s29 + $0x64] sm:$0xf] %vm1224_vm4, %v1915_v36  ;;  %v1405_v49 = vadd.f32 %v1404_v48, %v1403_v29  ;;  %v1469_v30 = vmul.f32 %v1954_v28, %v1954_v28 }
 0x1f1   : > { %1234 = vst.msk [vmem:[%s3038_s29 + $0x24] sm:$0xf] %vm1224_vm4, %v1899_v41  ;;  %v1507_v51 = vsel %vm1386_vm5, %v1467_v6, 0.0  ;;  %v1509_v42 = vsel %vm1386_vm5, %v1468_v5, 0.0  ;;  %v1408_v39 = vsel %vm1386_vm5, %v1954_v28, 0.0  ;;  %v1474_v34 = vmul.f32 %v3030_v19, %v3030_v19 }
 0x1f2   : > { %1309 = vrot.lane.b32.xlu0 %v1916_v14, %s2496_s11  ;;  %v1407_v31 = vadd.f32 %v1406_v62, %v1405_v49  ;;  %v1508_v53 = vadd.f32 %v1507_v51, %v1506_v4  ;;  %v1511_v55 = vsel %vm1386_vm5, %v1469_v30, 0.0 }
 0x1f4   : > { %1311 = vrot.lane.b32.xlu1 %v1917_v35, %s2496_s11  ;;  %v1510_v54 = vadd.f32 %v1509_v42, %v1508_v53  ;;  %v1409_v40 = vadd.f32 %v1408_v39, %v1407_v31 }
 0x1f6   : > { %1273 = vrot.lane.b32.xlu0 %v1898_v15, %s2496_s11  ;;  %v1512_v56 = vadd.f32 %v1511_v55, %v1510_v54 }
 0x1f8   : > { %1275 = vrot.lane.b32.xlu1 %v1899_v41, %s2496_s11 }
 0x1fa   : > { %1305 = vrot.lane.b32.xlu0 %v1914_v38, %s2496_s11 }
 0x1fc   : > { %1307 = vrot.lane.b32.xlu1 %v1915_v36, %s2496_s11 }
 0x202   : > { %v3174_v12 = vpop.f32.mrb[12].mxu1 }
 0x203   : > { %v1957_v57 = vpop.f32.mrb[12].mxu0  ;;  %v3178_v13 = vpack.c.bf16 %v3174_v12, %v3174_v12  ;;  %v3180_v58 = vpop.f32.mrb[13].mxu1 }
 0x204   : > { %v1904_v63 = vpack.c.bf16 %v1957_v57, %v1957_v57  ;;  %v1017_v32 = vpop.f32.mrb[13].mxu0  ;;  %v1918_v59 = vpack.c.bf16 %v3180_v58, %v3180_v58  ;;  %v3184_v60 = vpop.f32.mrb[14].mxu1  ;;  %v1472_v24 = vmul.f32 %v1957_v57, %v1957_v57  ;;  %v1414_v15 = vsel %vm1386_vm5, %v1957_v57, 0.0 }
 0x205   : > { %1255 = vst.msk [vmem:[%s3038_s29 + $0x78] sm:$0xf] %vm1224_vm4, %v3178_v13  ;;  %v1902_v0 = vpack.c.bf16 %v1017_v32, %v1017_v32  ;;  %v1410_v33 = vsel %vm1386_vm5, %v1017_v32, 0.0  ;;  %v1470_v1 = vmul.f32 %v1017_v32, %v1017_v32  ;;  %v1958_v2 = vpop.f32.mrb[14].mxu0  ;;  %v3190_v7 = vpop.f32.mrb[15].mxu1  ;;  %v3202_v20 = vpack.c.bf16 %v3184_v60, %v3184_v60 }
 0x206   : > { %1239 = vst.msk [vmem:[%s3038_s29 + $0x38] sm:$0xf] %vm1224_vm4, %v1904_v63  ;;  %v1411_v8 = vadd.f32 %v1410_v33, %v1409_v40  ;;  %1253 = vst.msk [vmem:[%s3038_s29 + $0x70] sm:$0xf] %vm1224_vm4, %v1918_v59  ;;  %1285 = vrot.lane.b32.xlu0 %v1904_v63, %s2496_s11  ;;  %v1020_v18 = vpop.f32.mrb[15].mxu0  ;;  %v1905_v16 = vpack.c.bf16 %v1958_v2, %v1958_v2  ;;  %v1919_v23 = vpack.c.bf16 %v3190_v7, %v3190_v7 }
 0x207   : > { %1237 = vst.msk [vmem:[%s3038_s29 + $0x30] sm:$0xf] %vm1224_vm4, %v1902_v0  ;;  %v1513_v10 = vsel %vm1386_vm5, %v1470_v1, 0.0  ;;  %1256 = vst.msk [vmem:[%s3038_s29 + $0x7c] sm:$0xf] %vm1224_vm4, %v3202_v20  ;;  %v1903_v14 = vpack.c.bf16 %v1020_v18, %v1020_v18  ;;  %v1412_v37 = vsel %vm1386_vm5, %v1020_v18, 0.0  ;;  %v1471_v27 = vmul.f32 %v1020_v18, %v1020_v18 }
 0x208   : > { %v1514_v17 = vadd.f32 %v1513_v10, %v1512_v56  ;;  %1240 = vst.msk [vmem:[%s3038_s29 + $0x3c] sm:$0xf] %vm1224_vm4, %v1905_v16  ;;  %1287 = vrot.lane.b32.xlu1 %v1905_v16, %s2496_s11  ;;  %1254 = vst.msk [vmem:[%s3038_s29 + $0x74] sm:$0xf] %vm1224_vm4, %v1919_v23  ;;  %v1413_v38 = vadd.f32 %v1412_v37, %v1411_v8  ;;  %v1473_v44 = vmul.f32 %v1958_v2, %v1958_v2 }
 0x209   : > { %1238 = vst.msk [vmem:[%s3038_s29 + $0x34] sm:$0xf] %vm1224_vm4, %v1903_v14  ;;  %v1515_v25 = vsel %vm1386_vm5, %v1471_v27, 0.0  ;;  %v1517_v3 = vsel %vm1386_vm5, %v1472_v24, 0.0  ;;  %v1416_v46 = vsel %vm1386_vm5, %v1958_v2, 0.0 }
 0x20a   : > { %1281 = vrot.lane.b32.xlu0 %v1902_v0, %s2496_s11  ;;  %v1415_v28 = vadd.f32 %v1414_v15, %v1413_v38  ;;  %v1516_v29 = vadd.f32 %v1515_v25, %v1514_v17 }
 0x20c   : > { %1283 = vrot.lane.b32.xlu1 %v1903_v14, %s2496_s11  ;;  %v1417_v4 = vadd.f32 %v1416_v46, %v1415_v28  ;;  %v1518_v35 = vadd.f32 %v1517_v3, %v1516_v29 }
 0x20e   : > { %1313 = vrot.lane.b32.xlu0 %v1918_v59, %s2496_s11 }
 0x20f   : > { %2368 = shalt.err (!%p2365_p7)
}
 0x210   : > { %s2369_s10 = scalar_lea.hbm %s3226_s28, 2048  ;;  %s2373_s9 = scalar_lea.hbm %s3512_s2, 4096 }
 0x211   : > { %p2370_p9 = scmp.ne.s32.totalorder %s3226_s28, %s2369_s10  ;;  %p2374_p5 = scmp.lt.u32.totalorder %s3226_s28, %s3512_s2 }
 0x212   : > { %p2375_p11 = scmp.lt.u32.totalorder %s2373_s9, %s2369_s10  ;;  %p2377_p4 = scmp.lt.u32.totalorder %s2369_s10, %s3226_s28 }
 0x213   : > { %p2371_p2 = pnand %p2370_p9, %p2619_p12 }
 0x214   : > { %p2376_p1 = por %p2375_p11, %p2374_p5 }
 0x215   : > { %p2372_p0 = pneg %p2371_p2 }
 0x216   : > { %p2378_p6 = por %p2377_p4, %p2376_p1 }
 0x218   : > { %p2379_p8 = pnand %p2378_p6, %p2372_p0 }
 0x21a   : > { %2382 = shalt.err (!%p2379_p8)
}
 0x21b   : > { %s2498_s24 = smov 64   ;;  %v1418_v36 = vsel %vm1386_vm5, %v3030_v19, 0.0  ;;  %v1475_v5 = vmul.f32 %v3042_v11, %v3042_v11  ;;  %v1519_v41 = vsel %vm1386_vm5, %v1473_v44, 0.0  ;;  %1315 = vrot.lane.b32.xlu1 %v1919_v23, %s2496_s11  ;;  %v1476_v49 = vmul.f32 %v3026_v9, %v3026_v9  ;;  %1317 = vrot.lane.b32.xlu0 %v3178_v13, %s2496_s11  ;;  %s3428_s8 = scalar_lea.hbm %s3513_s3, %s1922_s6 }
 0x21c   : > { %1986 = dma.vmem_to_hbm [thread:$0]  (%p2619_p12), %s3230_s12, 2048, %s3226_s28, %s1561_s13, %s2498_s24, %s2498_s24, %s2493_s21   ;;  %v1419_v48 = vadd.f32 %v1418_v36, %v1417_v4  ;;  %v1520_v6 = vadd.f32 %v1519_v41, %v1518_v35  ;;  %v1521_v62 = vsel %vm1386_vm5, %v1474_v34, 0.0  ;;  %v1420_v30 = vsel %vm1386_vm5, %v3042_v11, 0.0 }
 0x21d   : > { %v1422_v31 = vsel %vm1386_vm5, %v3026_v9, 0.0  ;;  %v1477_v53 = vmul.f32 %v3034_v22, %v3034_v22  ;;  %v1523_v42 = vsel %vm1386_vm5, %v1475_v5, 0.0  ;;  %v1525_v11 = vsel %vm1386_vm5, %v1476_v49, 0.0  ;;  %s1565_s28 = sand.u32 1, %s2547_s19   ;;  %s1887_s13 = sshll.u32 %s2547_s19, 5 }
 0x21e   : > { %v1421_v19 = vadd.f32 %v1420_v30, %v1419_v48  ;;  %v1522_v51 = vadd.f32 %v1521_v62, %v1520_v6  ;;  %v1424_v40 = vsel %vm1386_vm5, %v3034_v22, 0.0  ;;  %v1478_v55 = vmul.f32 %v3082_v50, %v3082_v50  ;;  %s3435_s26 = scalar_lea.hbm %s3514_s4, %s1887_s13  ;;  %s3441_s19 = scalar_lea.sflag [#allocation9], %s1565_s28 }
 0x21f   : > { %1319 = vrot.lane.b32.xlu1 %v3202_v20, %s2496_s11  ;;  %v1527_v57 = vsel %vm1386_vm5, %v1477_v53, 0.0  ;;  %v1426_v13 = vsel %vm1386_vm5, %v3082_v50, 0.0  ;;  %v1479_v63 = vmul.f32 %v3091_v47, %v3091_v47  ;;  %v1480_v0 = vmul.f32 %v3078_v61, %v3078_v61  ;;  %s3350_s11 = scalar_lea.vmem [#allocation8], %s1764_s25  ;;  %s1766_s25 = sshll.u32 %s2667_s14, 1 }
 0x220   : > { %v1423_v39 = vadd.f32 %v1422_v31, %v1421_v19  ;;  %v1524_v54 = vadd.f32 %v1523_v42, %v1522_v51  ;;  %v1529_v22 = vsel %vm1386_vm5, %v1478_v55, 0.0  ;;  %v1428_v33 = vsel %vm1386_vm5, %v3091_v47, 0.0  ;;  %s3367_s14 = scalar_lea.vmem [#allocation10], %s1766_s25  ;;  %s1600_s12 = sshll.u32 %s3350_s11, 4  ;;  %s3430_s12 = int_to_ptr.vmem [resolvable:$true] %s1600_s12 }
 0x221   : > { %v1430_v8 = vsel %vm1386_vm5, %v3078_v61, 0.0  ;;  %v1481_v50 = vmul.f32 %v3086_v52, %v3086_v52  ;;  %v1531_v18 = vsel %vm1386_vm5, %v1479_v63, 0.0  ;;  %v1533_v17 = vsel %vm1386_vm5, %v1480_v0, 0.0  ;;  %s1616_s23 = sshll.u32 %s3367_s14, 4  ;;  %s2383_s25 = scalar_lea.vmem %s3430_s12, 2048  ;;  %s3437_s23 = int_to_ptr.vmem [resolvable:$true] %s1616_s23 }
 0x222   : > { %v1425_v56 = vadd.f32 %v1424_v40, %v1423_v39  ;;  %v1526_v9 = vadd.f32 %v1525_v11, %v1524_v54  ;;  %v1432_v20 = vsel %vm1386_vm5, %v3086_v52, 0.0  ;;  %v1482_v47 = vmul.f32 %v3130_v26, %v3130_v26  ;;  %p2384_p10 = scmp.ne.s32.totalorder %s3430_s12, %s2383_s25  ;;  %s2499_s6 = smov [#allocation8]  }
 0x223   : > { %v1535_v14 = vsel %vm1386_vm5, %v1481_v50, 0.0  ;;  %v1434_v61 = vsel %vm1386_vm5, %v3130_v26, 0.0  ;;  %v1483_v37 = vmul.f32 %v3139_v45, %v3139_v45  ;;  %v1484_v15 = vmul.f32 %v3126_v21, %v3126_v21 }
 0x224   : > { %v1427_v32 = vadd.f32 %v1426_v13, %v1425_v56  ;;  %v1528_v59 = vadd.f32 %v1527_v57, %v1526_v9  ;;  %v1537_v52 = vsel %vm1386_vm5, %v1482_v47, 0.0  ;;  %v1436_v44 = vsel %vm1386_vm5, %v3139_v45, 0.0  ;;  %p2385_p13 = pnand %p2384_p10, %p2619_p12 }
 0x225   : > { %v1438_v29 = vsel %vm1386_vm5, %v3126_v21, 0.0  ;;  %v1485_v26 = vmul.f32 %v3134_v43, %v3134_v43  ;;  %v1539_v34 = vsel %vm1386_vm5, %v1483_v37, 0.0  ;;  %v1541_v4 = vsel %vm1386_vm5, %v1484_v15, 0.0 }
 0x226   : > { %v1429_v1 = vadd.f32 %v1428_v33, %v1427_v32  ;;  %v1530_v2 = vadd.f32 %v1529_v22, %v1528_v59  ;;  %v1440_v35 = vsel %vm1386_vm5, %v3134_v43, 0.0  ;;  %v1486_v45 = vmul.f32 %v3180_v58, %v3180_v58  ;;  %p2386_p3 = pneg %p2385_p13 }
 0x227   : > { %v1543_v41 = vsel %vm1386_vm5, %v1485_v26, 0.0  ;;  %v1442_v21 = vsel %vm1386_vm5, %v3180_v58, 0.0  ;;  %v1487_v48 = vmul.f32 %v3190_v7, %v3190_v7  ;;  %v1488_v62 = vmul.f32 %v3174_v12, %v3174_v12 }
 0x228   : > { %v1431_v10 = vadd.f32 %v1430_v8, %v1429_v1  ;;  %v1532_v16 = vadd.f32 %v1531_v18, %v1530_v2  ;;  %v1545_v43 = vsel %vm1386_vm5, %v1486_v45, 0.0  ;;  %v1444_v30 = vsel %vm1386_vm5, %v3190_v7, 0.0 }
 0x229   : > { %v1446_v31 = vsel %vm1386_vm5, %v3174_v12, 0.0  ;;  %v1489_v58 = vmul.f32 %v3184_v60, %v3184_v60  ;;  %v1547_v53 = vsel %vm1386_vm5, %v1487_v48, 0.0  ;;  %v1549_v54 = vsel %vm1386_vm5, %v1488_v62, 0.0 }
 0x22a   : > { %v1433_v23 = vadd.f32 %v1432_v20, %v1431_v10  ;;  %v1534_v24 = vadd.f32 %v1533_v17, %v1532_v16  ;;  %v1448_v11 = vsel %vm1386_vm5, %v3184_v60, 0.0  ;;  %vm1353_vm6 = vcmask 60416  }
 0x22b   : > { %v1551_v55 = vsel %vm1386_vm5, %v1489_v58, 0.0  ;;  %vm1456_vm7 = vcmask 319488  }
 0x22c   : > { %v1435_v27 = vadd.f32 %v1434_v61, %v1433_v23  ;;  %v1536_v38 = vadd.f32 %v1535_v14, %v1534_v24 }
 0x22e   : > { %v1437_v25 = vadd.f32 %v1436_v44, %v1435_v27  ;;  %v1538_v28 = vadd.f32 %v1537_v52, %v1536_v38 }
 0x230   : > { %v1439_v3 = vadd.f32 %v1438_v29, %v1437_v25  ;;  %v1540_v46 = vadd.f32 %v1539_v34, %v1538_v28  ;;  %v1262_v56 = vpop.permute.xlu0 %1261 }
 0x231   : > { %1356 = vst.msk [vmem:[%s3350_s11 + $0x8] sm:$0xf] %vm1353_vm6, %v1262_v56 }
 0x232   : > { %v1441_v36 = vadd.f32 %v1440_v35, %v1439_v3  ;;  %v1542_v5 = vadd.f32 %v1541_v4, %v1540_v46  ;;  %v1264_v60 = vpop.permute.xlu1 %1263 }
 0x233   : > { %1357 = vst.msk [vmem:[%s3350_s11 + $0xc] sm:$0xf] %vm1353_vm6, %v1264_v60 }
 0x234   : > { %v1544_v6 = vadd.f32 %v1543_v41, %v1542_v5  ;;  %v1443_v49 = vadd.f32 %v1442_v21, %v1441_v36  ;;  %v1294_v63 = vpop.permute.xlu0 %1293 }
 0x235   : > { %1372 = vst.msk [vmem:[%s3350_s11 + $0x48] sm:$0xf] %vm1353_vm6, %v1294_v63 }
 0x236   : > { %v1445_v19 = vadd.f32 %v1444_v30, %v1443_v49  ;;  %v1546_v51 = vadd.f32 %v1545_v43, %v1544_v6  ;;  %v1296_v0 = vpop.permute.xlu1 %1295 }
 0x237   : > { %1373 = vst.msk [vmem:[%s3350_s11 + $0x4c] sm:$0xf] %vm1353_vm6, %v1296_v0 }
 0x238   : > { %v1447_v42 = vadd.f32 %v1446_v31, %v1445_v19  ;;  %v1548_v39 = vadd.f32 %v1547_v53, %v1546_v51  ;;  %v1258_v1 = vpop.permute.xlu0 %1257 }
 0x239   : > { %1354 = vst.msk [vmem:[%s3350_s11] sm:$0xf] %vm1353_vm6, %v1258_v1 }
 0x23a   : > { %v1449_v40 = vadd.f32 %v1448_v11, %v1447_v42  ;;  %v1550_v7 = vadd.f32 %v1549_v54, %v1548_v39  ;;  %v1260_v50 = vpop.permute.xlu1 %1259 }
 0x23b   : > { %1355 = vst.msk [vmem:[%s3350_s11 + $0x4] sm:$0xf] %vm1353_vm6, %v1260_v50 }
 0x23c   : > { %v1450_v12 = vrot.slane %v1449_v40, 4  ;;  %v1552_v9 = vadd.f32 %v1551_v55, %v1550_v7  ;;  %v1290_v16 = vpop.permute.xlu0 %1289 }
 0x23d   : > { %1370 = vst.msk [vmem:[%s3350_s11 + $0x40] sm:$0xf] %vm1353_vm6, %v1290_v16 }
 0x23e   : > { %v1451_v57 = vadd.f32 %v1450_v12, %v1449_v40  ;;  %v1553_v13 = vrot.slane %v1552_v9, 4  ;;  %v1292_v20 = vpop.permute.xlu1 %1291 }
 0x23f   : > { %1371 = vst.msk [vmem:[%s3350_s11 + $0x44] sm:$0xf] %vm1353_vm6, %v1292_v20 }
 0x240   : > { %v1452_v32 = vrot.slane %v1451_v57, 2  ;;  %v1554_v59 = vadd.f32 %v1553_v13, %v1552_v9 }
 0x242   : > { %v1453_v22 = vadd.f32 %v1452_v32, %v1451_v57  ;;  %v1555_v33 = vrot.slane %v1554_v59, 2 }
 0x244   : > { %v1454_v2 = vrot.slane %v1453_v22, 1  ;;  %v1556_v8 = vadd.f32 %v1555_v33, %v1554_v59 }
 0x246   : > { %v1455_v18 = vadd.f32 %v1454_v2, %v1453_v22  ;;  %v1557_v10 = vrot.slane %v1556_v8, 1 }
 0x248   : > { %1457 = vst.msk [vmem:[%s3367_s14] sm:$0x1] %vm1456_vm7, %v1455_v18  ;;  %v1558_v17 = vadd.f32 %v1557_v10, %v1556_v8  ;;  %v1270_v47 = vpop.permute.xlu0 %1269 }
 0x249   : > { %1360 = vst.msk [vmem:[%s3350_s11 + $0x18] sm:$0xf] %vm1353_vm6, %v1270_v47 }
 0x24a   : > { %1559 = vst.msk [vmem:[%s3367_s14 + $0x1] sm:$0x1] %vm1456_vm7, %v1558_v17  ;;  %v1272_v23 = vpop.permute.xlu1 %1271  ;;  %s2387_s14 = sshll.u32 %s2499_s6, 4  ;;  %s2388_s14 = int_to_ptr.vmem [resolvable:$false] %s2387_s14 }
 0x24b   : > { %1361 = vst.msk [vmem:[%s3350_s11 + $0x1c] sm:$0xf] %vm1353_vm6, %v1272_v23  ;;  %s2389_s10 = scalar_lea.vmem %s2388_s14, 4096  ;;  %p2390_p7 = scmp.lt.s32.totalorder %s3430_s12, %s2388_s14 }
 0x24c   : > { %v1302_v24 = vpop.permute.xlu0 %1301  ;;  %p2391_p9 = scmp.lt.s32.totalorder %s2389_s10, %s2383_s25 }
 0x24d   : > { %1376 = vst.msk [vmem:[%s3350_s11 + $0x58] sm:$0xf] %vm1353_vm6, %v1302_v24 }
 0x24e   : > { %v1304_v14 = vpop.permute.xlu1 %1303  ;;  %p2392_p2 = por %p2391_p9, %p2390_p7 }
 0x24f   : > { %1377 = vst.msk [vmem:[%s3350_s11 + $0x5c] sm:$0xf] %vm1353_vm6, %v1304_v14 }
 0x250   : > { %v1266_v61 = vpop.permute.xlu0 %1265  ;;  %p2393_p0 = pnand %p2392_p2, %p2386_p3 }
 0x251   : > { %1358 = vst.msk [vmem:[%s3350_s11 + $0x10] sm:$0xf] %vm1353_vm6, %v1266_v61 }
 0x252   : > { %v1268_v37 = vpop.permute.xlu1 %1267 }
 0x253   : > { %1359 = vst.msk [vmem:[%s3350_s11 + $0x14] sm:$0xf] %vm1353_vm6, %v1268_v37 }
 0x254   : > { %v1298_v27 = vpop.permute.xlu0 %1297 }
 0x255   : > { %1374 = vst.msk [vmem:[%s3350_s11 + $0x50] sm:$0xf] %vm1353_vm6, %v1298_v27 }
 0x256   : > { %v1300_v38 = vpop.permute.xlu1 %1299 }
 0x257   : > { %1375 = vst.msk [vmem:[%s3350_s11 + $0x54] sm:$0xf] %vm1353_vm6, %v1300_v38 }
 0x260   : > { %v1278_v15 = vpop.permute.xlu0 %1277 }
 0x261   : > { %1364 = vst.msk [vmem:[%s3350_s11 + $0x28] sm:$0xf] %vm1353_vm6, %v1278_v15 }
 0x262   : > { %v1280_v52 = vpop.permute.xlu1 %1279 }
 0x263   : > { %1365 = vst.msk [vmem:[%s3350_s11 + $0x2c] sm:$0xf] %vm1353_vm6, %v1280_v52 }
 0x264   : > { %v1310_v44 = vpop.permute.xlu0 %1309 }
 0x265   : > { %1380 = vst.msk [vmem:[%s3350_s11 + $0x68] sm:$0xf] %vm1353_vm6, %v1310_v44 }
 0x266   : > { %v1312_v25 = vpop.permute.xlu1 %1311 }
 0x267   : > { %1381 = vst.msk [vmem:[%s3350_s11 + $0x6c] sm:$0xf] %vm1353_vm6, %v1312_v25 }
 0x268   : > { %v1274_v28 = vpop.permute.xlu0 %1273 }
 0x269   : > { %1362 = vst.msk [vmem:[%s3350_s11 + $0x20] sm:$0xf] %vm1353_vm6, %v1274_v28 }
 0x26a   : > { %v1276_v29 = vpop.permute.xlu1 %1275 }
 0x26b   : > { %1363 = vst.msk [vmem:[%s3350_s11 + $0x24] sm:$0xf] %vm1353_vm6, %v1276_v29 }
 0x26c   : > { %v1306_v26 = vpop.permute.xlu0 %1305 }
 0x26d   : > { %1378 = vst.msk [vmem:[%s3350_s11 + $0x60] sm:$0xf] %vm1353_vm6, %v1306_v26 }
 0x26e   : > { %v1308_v34 = vpop.permute.xlu1 %1307 }
 0x26f   : > { %1379 = vst.msk [vmem:[%s3350_s11 + $0x64] sm:$0xf] %vm1353_vm6, %v1308_v34 }
 0x278   : > { %v1286_v3 = vpop.permute.xlu0 %1285 }
 0x279   : > { %1368 = vst.msk [vmem:[%s3350_s11 + $0x38] sm:$0xf] %vm1353_vm6, %v1286_v3 }
 0x27a   : > { %v1288_v46 = vpop.permute.xlu1 %1287 }
 0x27b   : > { %1369 = vst.msk [vmem:[%s3350_s11 + $0x3c] sm:$0xf] %vm1353_vm6, %v1288_v46 }
 0x27c   : > { %v1282_v4 = vpop.permute.xlu0 %1281 }
 0x27d   : > { %1366 = vst.msk [vmem:[%s3350_s11 + $0x30] sm:$0xf] %vm1353_vm6, %v1282_v4 }
 0x27e   : > { %v1284_v35 = vpop.permute.xlu1 %1283 }
 0x27f   : > { %1367 = vst.msk [vmem:[%s3350_s11 + $0x34] sm:$0xf] %vm1353_vm6, %v1284_v35 }
 0x280   : > { %v1314_v45 = vpop.permute.xlu0 %1313 }
 0x281   : > { %1382 = vst.msk [vmem:[%s3350_s11 + $0x70] sm:$0xf] %vm1353_vm6, %v1314_v45 }
 0x28d   : > { %v1316_v36 = vpop.permute.xlu1 %1315  ;;  %v1318_v5 = vpop.permute.xlu0 %1317 }
 0x28e   : > { %1383 = vst.msk [vmem:[%s3350_s11 + $0x74] sm:$0xf] %vm1353_vm6, %v1316_v36  ;;  %1384 = vst.msk [vmem:[%s3350_s11 + $0x78] sm:$0xf] %vm1353_vm6, %v1318_v5 }
 0x291   : > { %v1320_v41 = vpop.permute.xlu1 %1319 }
 0x292   : > { %1385 = vst.msk [vmem:[%s3350_s11 + $0x7c] sm:$0xf] %vm1353_vm6, %v1320_v41 }
 0x293   : > { %2396 = shalt.err (!%p2393_p0)
}
 0x294   : > { %s2397_s11 = scalar_lea.hbm %s3428_s8, 2048  ;;  %s2401_s29 = scalar_lea.hbm %s3513_s3, 4096 }
 0x295   : > { %p2398_p5 = scmp.ne.s32.totalorder %s3428_s8, %s2397_s11  ;;  %p2402_p4 = scmp.lt.u32.totalorder %s3428_s8, %s3513_s3 }
 0x296   : > { %p2403_p6 = scmp.lt.u32.totalorder %s2401_s29, %s2397_s11  ;;  %p2405_p10 = scmp.lt.u32.totalorder %s2397_s11, %s3428_s8 }
 0x297   : > { %p2399_p11 = pnand %p2398_p5, %p2619_p12 }
 0x298   : > { %p2404_p8 = por %p2403_p6, %p2402_p4 }
 0x299   : > { %p2400_p1 = pneg %p2399_p11 }
 0x29a   : > { %p2406_p13 = por %p2405_p10, %p2404_p8 }
 0x29c   : > { %p2407_p3 = pnand %p2406_p13, %p2400_p1 }
 0x29e   : > { %2410 = shalt.err (!%p2407_p3)
}
 0x29f   : > { %1987 = dma.vmem_to_hbm [thread:$0]  (%p2619_p12), %s3430_s12, 2048, %s3428_s8, %s3441_s19, %s2498_s24, %s2498_s24, %s2493_s21  }
 0x2a0   : > { %s2411_s25 = scalar_lea.vmem %s3437_s23, 32  ;;  %s2500_s6 = smov [#allocation10]  }
 0x2a1   : > { %p2412_p7 = scmp.ne.s32.totalorder %s3437_s23, %s2411_s25  ;;  %s2415_s14 = sshll.u32 %s2500_s6, 4  ;;  %s2416_s14 = int_to_ptr.vmem [resolvable:$false] %s2415_s14 }
 0x2a2   : > { %s2417_s10 = scalar_lea.vmem %s2416_s14, 64  ;;  %p2418_p0 = scmp.lt.s32.totalorder %s3437_s23, %s2416_s14 }
 0x2a3   : > { %p2413_p9 = pnand %p2412_p7, %p2619_p12  ;;  %p2419_p5 = scmp.lt.s32.totalorder %s2417_s10, %s2411_s25 }
 0x2a5   : > { %p2414_p2 = pneg %p2413_p9  ;;  %p2420_p11 = por %p2419_p5, %p2418_p0 }
 0x2a7   : > { %p2421_p1 = pnand %p2420_p11, %p2414_p2 }
 0x2a9   : > { %2424 = shalt.err (!%p2421_p1)
}
 0x2aa   : > { %s2425_s21 = scalar_lea.hbm %s3435_s26, 32  ;;  %s2429_s8 = scalar_lea.hbm %s3514_s4, 64 }
 0x2ab   : > { %p2426_p4 = scmp.ne.s32.totalorder %s3435_s26, %s2425_s21  ;;  %p2430_p10 = scmp.lt.u32.totalorder %s3435_s26, %s3514_s4 }
 0x2ac   : > { %p2431_p13 = scmp.lt.u32.totalorder %s2429_s8, %s2425_s21  ;;  %p2433_p7 = scmp.lt.u32.totalorder %s2425_s21, %s3435_s26 }
 0x2ad   : > { %p2427_p6 = pnand %p2426_p4, %p2619_p12 }
 0x2ae   : > { %p2432_p3 = por %p2431_p13, %p2430_p10 }
 0x2af   : > { %p2428_p8 = pneg %p2427_p6 }
 0x2b0   : > { %p2434_p9 = por %p2433_p7, %p2432_p3 }
 0x2b2   : > { %p2435_p2 = pnand %p2434_p9, %p2428_p8 }
 0x2b4   : > { %2438 = shalt.err (!%p2435_p2)
}
 0x2b5   : > { %1988 = dma.vmem_to_hbm [thread:$0]  (%p2619_p12), %s3437_s23, 32, %s3435_s26, %s3441_s19  }
 0x2b6 PF: > { %s1628_s13 = sand.u32 1, %s2473_s15   ;;  %p3529_p0 = scmp.ne.s32.totalorder %s3519_s22, 0 }
 0x2b7   : > { %p3530_p5 = scmp.ge.s32.totalorder %s2485_s18, 2  ;;  %s1629_s29 = scalar_lea.sflag [#allocation4], %s1628_s13 }
 0x2b9   : > { %p2001_p11 = pnand %p3530_p5, %p3529_p0 }
 0x2bb   : > { %2464 = dma.done.wait (!%p2001_p11), %s1629_s29, 2048  }
 0x2bc   : > { %2466 = vsyncadd (!%p2001_p11), %s1629_s29, 4294965248  ;;  %s1637_s9 = sand.u32 1, %s1757_s20  }
 0x2bd   : > { %s1638_s7 = scalar_lea.sflag [#allocation9], %s1637_s9 }
 0x2be   : > { %2468 = dma.done.wait (!%p2001_p11), %s1638_s7, 2080  }
 0x2bf   : > { %2470 = vsyncadd (!%p2001_p11), %s1638_s7, 4294965216  ;;  %p22_p12 = scmp.ge.s32.totalorder %s2584_s27, 4   ;;  %s3531_s15 = smov %s2477_s16 }
 0x2c0   : > { %s3532_s16 = smov %s2481_s17  ;;  %s3533_s17 = smov %s2615_s30 }
 0x2c1   : > { %s3534_s18 = smov %s2584_s27  ;;  %24 = sbr.rel (!%p22_p12) target bundleno = 8 (0x8), region = 110 }
 0x2c8   :  { %1652 = vsyncpa [#allocation3], 1 }
 0x2c9   :  { %1654 = vsyncpa [#allocation3 + $0x1], 1 }
 0x2ca   :  { %1655 = vsyncpa [#allocation6], 1 }
 0x2cb   :  { %1656 = vsyncpa [#allocation4], 1 }
 0x2cc   :  { %1658 = vsyncpa [#allocation4 + $0x1], 1 }
 0x2cd   :  { %1659 = vsyncpa [#allocation9], 1 }
 0x2ce   :  { %1661 = vsyncpa [#allocation9 + $0x1], 1 }

</bundles_post_ra>
